<compile_context>
chip_gen: v7x
topology: tpu7x:2x2x1
jax: 0.10.0
libtpu: 0.0.40
codegen_flags: <defaults>
</compile_context>

<pallas_src>
import functools

import jax
import jax.numpy as jnp
from jax.experimental import pallas as pl
from jax.experimental.pallas import tpu as pltpu


def _encoder_kernel(obs_ref, wx_ref, bx_ref, whh_ref, out_ref,
                    c_sc, gx_sc, *, h_dim, gate_pitch, seq_len):
    H = h_dim
    GP = gate_pitch          # 128-lane-aligned gate pitch
    T = seq_len

    # ---- input projection for this batch tile, on the VPU (K=2 FMAs) --------
    # gates_x = obs_x * w_x[0] + obs_y * w_x[1] + b_x   (columns gate-padded)
    obs = obs_ref[...]                                  # (T, Bt, 2) f32
    wx0 = wx_ref[0:1, :][None]                          # (1, 1, 4*GP)
    wx1 = wx_ref[1:2, :][None]                          # (1, 1, 4*GP)
    bx = bx_ref[...][None]                              # (1, 1, 4*GP)
    gx_sc[...] = obs[:, :, 0:1] * wx0 + obs[:, :, 1:2] * wx1 + bx

    # init_hidden: h lives directly in out_ref, c in scratch
    out_ref[...] = jnp.zeros_like(out_ref)
    c_sc[...] = jnp.zeros_like(c_sc)

    w_hh = whh_ref[...]                                 # (H, 4*GP) bf16

    # ---- T-step recurrence inside a single kernel invocation -----------------
    def step(t, carry):
        # only h @ W_hh is on the serial chain; gates_x[t] is precomputed
        gates = gx_sc[t] + jnp.dot(
            out_ref[...].astype(jnp.bfloat16), w_hh,
            preferred_element_type=jnp.float32)         # (Bt, 4*GP) f32

        # every slice starts on a 128-lane boundary -> no cross-lane rotates
        i_g = jax.nn.sigmoid(gates[:, 0 * GP:0 * GP + H])
        f_g = jax.nn.sigmoid(gates[:, 1 * GP:1 * GP + H])
        g_g = jnp.tanh(gates[:, 2 * GP:2 * GP + H])
        o_g = jax.nn.sigmoid(gates[:, 3 * GP:3 * GP + H])

        c_new = f_g * c_sc[...] + i_g * g_g
        out_ref[...] = o_g * jnp.tanh(c_new)
        c_sc[...] = c_new
        return carry

    jax.lax.fori_loop(0, T, step, 0, unroll=(True if T <= 16 else 8))


def encoder_forward(obs_traj, params, *, b_tile=64):
    """obs_traj: (T, B, 2) f32 -> final_h: (1, B, h_dim) f32."""
    T, B, _ = obs_traj.shape
    w_emb, b_emb, w_ih, w_hh, b = params
    H = w_hh.shape[0]
    GP = ((H + 127) // 128) * 128        # gate pitch: each gate 128-lane aligned

    # ---- one-time (offline) parameter fusion ---------------------------------
    # Fuse Linear(2->E) into the LSTM input projection (no activation between):
    #   (obs @ W_emb + b_emb) @ W_ih + b == obs @ (W_emb @ W_ih) + (b_emb @ W_ih + b)
    w_x = w_emb @ w_ih                                   # (2, 4H)
    b_x = b_emb @ w_ih + b                               # (1, 4H)

    # Scatter each PyTorch gate [i, f, g, o] into its own 128-lane-aligned slot.
    def pad_gates(m):                                    # (..., 4H) -> (..., 4*GP)
        out = jnp.zeros(m.shape[:-1] + (4 * GP,), m.dtype)
        for k in range(4):
            out = out.at[..., k * GP:k * GP + H].set(m[..., k * H:(k + 1) * H])
        return out

    w_x_p = pad_gates(w_x)                               # (2, 4*GP) f32
    b_x_p = pad_gates(b_x)                               # (1, 4*GP) f32
    w_hh_p = pad_gates(w_hh).astype(jnp.bfloat16)        # (H, 4*GP) bf16

    # ---- batch tiling: sublane-pad and split over a parallel grid axis -------
    b_tile = max(8, (b_tile // 8) * 8)
    B_TILE = min(((B + 7) // 8) * 8, b_tile)
    B_pad = ((B + B_TILE - 1) // B_TILE) * B_TILE
    n_tiles = B_pad // B_TILE
    obs_p = jnp.pad(obs_traj, ((0, 0), (0, B_pad - B), (0, 0)))

    kernel = functools.partial(_encoder_kernel, h_dim=H, gate_pitch=GP, seq_len=T)

    out = pl.pallas_call(
        kernel,
        out_shape=jax.ShapeDtypeStruct((B_pad, H), jnp.float32),
        grid=(n_tiles,),
        in_specs=[
            pl.BlockSpec((T, B_TILE, 2), lambda bt: (0, bt, 0)),   # obs tile
            pl.BlockSpec((2, 4 * GP), lambda bt: (0, 0)),          # fused W_x
            pl.BlockSpec((1, 4 * GP), lambda bt: (0, 0)),          # fused bias
            pl.BlockSpec((H, 4 * GP), lambda bt: (0, 0)),          # W_hh (bf16)
        ],
        out_specs=pl.BlockSpec((B_TILE, H), lambda bt: (bt, 0)),   # h (used as state)
        scratch_shapes=[
            pltpu.VMEM((B_TILE, H), jnp.float32),                  # c
            pltpu.VMEM((T, B_TILE, 4 * GP), jnp.float32),          # per-tile gates_x
        ],
        compiler_params=pltpu.CompilerParams(
            dimension_semantics=("parallel",),
            vmem_limit_bytes=32 * 1024 * 1024),
    )(obs_p, w_x_p, b_x_p, w_hh_p)

    return out[None, :B, :]


def reference_forward(obs_traj, params, recurrent_matmul_dtype=jnp.float32):
    """Pure-JAX reference of the PyTorch forward pass (unfused)."""
    w_emb, b_emb, w_ih, w_hh, b = params
    T, B, _ = obs_traj.shape
    H = w_hh.shape[0]
    emb = obs_traj.reshape(-1, 2) @ w_emb + b_emb                    # (T*B, E)
    emb = emb.reshape(T, B, -1)
    w_hh_c = w_hh.astype(recurrent_matmul_dtype)

    def step(carry, x_t):
        h, c = carry
        rec = jnp.dot(h.astype(recurrent_matmul_dtype), w_hh_c,
                      preferred_element_type=jnp.float32)
        gates = x_t @ w_ih + rec + b
        i_g = jax.nn.sigmoid(gates[:, 0 * H:1 * H])
        f_g = jax.nn.sigmoid(gates[:, 1 * H:2 * H])
        g_g = jnp.tanh(gates[:, 2 * H:3 * H])
        o_g = jax.nn.sigmoid(gates[:, 3 * H:4 * H])
        c_new = f_g * c + i_g * g_g
        h_new = o_g * jnp.tanh(c_new)
        return (h_new, c_new), None

    h0 = jnp.zeros((B, H), jnp.float32)
    c0 = jnp.zeros((B, H), jnp.float32)
    (h_final, _), _ = jax.lax.scan(step, (h0, c0), emb)
    return h_final[None]                                             # (1, B, H)


def make_params(key, embedding_dim, h_dim):
    """Deterministic synthetic parameters (matching nn.Linear / nn.LSTM shapes)."""
    ks = jax.random.split(key, 6)
    # nn.Linear(2, E): weight (E, 2), bias (E,)  -> stored transposed (2, E), (1, E)
    w_emb = jax.random.normal(ks[0], (2, embedding_dim), jnp.float32) * 0.3
    b_emb = jax.random.normal(ks[1], (1, embedding_dim), jnp.float32) * 0.1
    # nn.LSTM: weight_ih_l0 (4H, E), weight_hh_l0 (4H, H), biases (4H,)
    #          -> stored transposed (E, 4H), (H, 4H); biases summed as (1, 4H).
    w_ih = jax.random.normal(ks[2], (embedding_dim, 4 * h_dim), jnp.float32) * 0.2
    w_hh = jax.random.normal(ks[3], (h_dim, 4 * h_dim), jnp.float32) * 0.2
    b_ih = jax.random.normal(ks[4], (1, 4 * h_dim), jnp.float32) * 0.1
    b_hh = jax.random.normal(ks[5], (1, 4 * h_dim), jnp.float32) * 0.1
    return (w_emb, b_emb, w_ih, w_hh, b_ih + b_hh)


if __name__ == "__main__":
    OBS_LEN, BATCH = 8, 4
    EMBEDDING_DIM, H_DIM = 32, 32      # small shapes; module defaults are 64/64

    key = jax.random.PRNGKey(0)
    k_obs, k_par = jax.random.split(key)
    obs_traj = jax.random.normal(k_obs, (OBS_LEN, BATCH, 2), jnp.float32)
    params = make_params(k_par, EMBEDDING_DIM, H_DIM)

    final_h = encoder_forward(obs_traj, params)
    final_h = jax.block_until_ready(final_h)
    assert final_h.shape == (1, BATCH, H_DIM)

    # Tight check vs a reference that also does the recurrent matmul in bf16
    # (isolates the intentional precision change).
    ref_bf16 = reference_forward(obs_traj, params,
                                 recurrent_matmul_dtype=jnp.bfloat16)
    assert jnp.allclose(final_h, ref_bf16, atol=1e-3, rtol=1e-3)

    # Looser check vs the exact f32 PyTorch-equivalent reference (bf16 W_hh on
    # the MXU + fused-weight f32 reassociation account for the slack).
    ref_f32 = reference_forward(obs_traj, params)
    assert jnp.allclose(final_h, ref_f32, atol=3e-2, rtol=3e-2)

    print("KERNEL_OK")
</pallas_src>

<mosaic_0001>
module attributes {stable_mosaic.version = 11 : i64} {
  func.func @_encoder_kernel(%arg0: i32, %arg1: memref<8x8x2xf32, #tpu.memory_space<vmem>>, %arg2: memref<2x512xf32, #tpu.memory_space<vmem>>, %arg3: memref<1x512xf32, #tpu.memory_space<vmem>>, %arg4: memref<32x512xbf16, #tpu.memory_space<vmem>>, %arg5: memref<8x32xf32, #tpu.memory_space<vmem>>, %arg6: memref<8x32xf32, #tpu.memory_space<vmem>>, %arg7: memref<8x8x512xf32, #tpu.memory_space<vmem>>) attributes {dimension_semantics = [#tpu.dimension_semantics<parallel>], iteration_bounds = array<i64: 1>, scalar_prefetch = 0 : i64, scratch_operands = 2 : i64, tpu.core_type = #tpu.core_type<tc>, window_params = [{transform_indices = @transform_0, window_bounds = array<i64: 8, 8, 2>}, {pipeline_mode = #tpu.pipeline_mode<synchronous>, transform_indices = @transform_1, window_bounds = array<i64: 2, 512>}, {pipeline_mode = #tpu.pipeline_mode<synchronous>, transform_indices = @transform_2, window_bounds = array<i64: 1, 512>}, {pipeline_mode = #tpu.pipeline_mode<synchronous>, transform_indices = @transform_3, window_bounds = array<i64: 32, 512>}, {transform_indices = @transform_4, window_bounds = array<i64: 8, 32>}]} {
    %c0 = arith.constant 0 : index
    %c0_0 = arith.constant 0 : index
    %c0_1 = arith.constant 0 : index
    %0 = vector.load %arg1[%c0, %c0_0, %c0_1] : memref<8x8x2xf32, #tpu.memory_space<vmem>>, vector<8x8x2xf32>
    %c0_2 = arith.constant 0 : index
    %c0_3 = arith.constant 0 : index
    %1 = vector.load %arg2[%c0_2, %c0_3] : memref<2x512xf32, #tpu.memory_space<vmem>>, vector<1x512xf32>
    %2 = vector.shape_cast %1 : vector<1x512xf32> to vector<1x1x512xf32>
    %c1 = arith.constant 1 : index
    %c0_4 = arith.constant 0 : index
    %3 = vector.load %arg2[%c1, %c0_4] : memref<2x512xf32, #tpu.memory_space<vmem>>, vector<1x512xf32>
    %4 = vector.shape_cast %3 : vector<1x512xf32> to vector<1x1x512xf32>
    %c0_5 = arith.constant 0 : index
    %c0_6 = arith.constant 0 : index
    %5 = vector.load %arg3[%c0_5, %c0_6] : memref<1x512xf32, #tpu.memory_space<vmem>>, vector<1x512xf32>
    %6 = vector.shape_cast %5 : vector<1x512xf32> to vector<1x1x512xf32>
    %7 = vector.extract_strided_slice %0 {offsets = [0, 0, 0], sizes = [8, 8, 1], strides = [1, 1, 1]} : vector<8x8x2xf32> to vector<8x8x1xf32>
    %8 = vector.broadcast %7 : vector<8x8x1xf32> to vector<8x8x512xf32>
    %9 = vector.broadcast %2 : vector<1x1x512xf32> to vector<8x8x512xf32>
    %10 = arith.mulf %8, %9 : vector<8x8x512xf32>
    %11 = vector.extract_strided_slice %0 {offsets = [0, 0, 1], sizes = [8, 8, 1], strides = [1, 1, 1]} : vector<8x8x2xf32> to vector<8x8x1xf32>
    %12 = vector.broadcast %11 : vector<8x8x1xf32> to vector<8x8x512xf32>
    %13 = vector.broadcast %4 : vector<1x1x512xf32> to vector<8x8x512xf32>
    %14 = arith.mulf %12, %13 : vector<8x8x512xf32>
    %15 = arith.addf %10, %14 : vector<8x8x512xf32>
    %16 = vector.broadcast %6 : vector<1x1x512xf32> to vector<8x8x512xf32>
    %17 = arith.addf %15, %16 : vector<8x8x512xf32>
    %c0_7 = arith.constant 0 : index
    %c0_8 = arith.constant 0 : index
    %c0_9 = arith.constant 0 : index
    %18 = vector.load %arg7[%c0_7, %c0_8, %c0_9] : memref<8x8x512xf32, #tpu.memory_space<vmem>>, vector<8x8x512xf32>
    tpu.vector_store %arg7[%c0_7, %c0_8, %c0_9], %17 {strides = array<i32>} : memref<8x8x512xf32, #tpu.memory_space<vmem>>, vector<8x8x512xf32>,
    %cst = arith.constant 0.000000e+00 : f32
    %19 = vector.broadcast %cst : f32 to vector<8x32xf32>
    %c0_10 = arith.constant 0 : index
    %c0_11 = arith.constant 0 : index
    %20 = vector.load %arg5[%c0_10, %c0_11] : memref<8x32xf32, #tpu.memory_space<vmem>>, vector<8x32xf32>
    tpu.vector_store %arg5[%c0_10, %c0_11], %19 {strides = array<i32>} : memref<8x32xf32, #tpu.memory_space<vmem>>, vector<8x32xf32>,
    %cst_12 = arith.constant 0.000000e+00 : f32
    %21 = vector.broadcast %cst_12 : f32 to vector<8x32xf32>
    %c0_13 = arith.constant 0 : index
    %c0_14 = arith.constant 0 : index
    %22 = vector.load %arg6[%c0_13, %c0_14] : memref<8x32xf32, #tpu.memory_space<vmem>>, vector<8x32xf32>
    tpu.vector_store %arg6[%c0_13, %c0_14], %21 {strides = array<i32>} : memref<8x32xf32, #tpu.memory_space<vmem>>, vector<8x32xf32>,
    %c0_15 = arith.constant 0 : index
    %c0_16 = arith.constant 0 : index
    %23 = vector.load %arg4[%c0_15, %c0_16] : memref<32x512xbf16, #tpu.memory_space<vmem>>, vector<32x512xbf16>
    %c0_i32 = arith.constant 0 : i32
    %24 = arith.index_cast %c0_i32 : i32 to index
    %c0_17 = arith.constant 0 : index
    %c0_18 = arith.constant 0 : index
    %25 = vector.load %arg7[%24, %c0_17, %c0_18] : memref<8x8x512xf32, #tpu.memory_space<vmem>>, vector<1x8x512xf32>
    %26 = vector.shape_cast %25 : vector<1x8x512xf32> to vector<8x512xf32>
    %c0_19 = arith.constant 0 : index
    %c0_20 = arith.constant 0 : index
    %27 = vector.load %arg5[%c0_19, %c0_20] : memref<8x32xf32, #tpu.memory_space<vmem>>, vector<8x32xf32>
    %28 = arith.truncf %27 : vector<8x32xf32> to vector<8x32xbf16>
    %cst_21 = arith.constant dense<0.000000e+00> : vector<8x512xf32>
    %29 = tpu.matmul %28, %23, %cst_21 {dimension_numbers = #tpu.dot_dimension_numbers<[1], [0], [0], [1], [0, 0, 1, 1], [], []>} : vector<8x32xbf16>, vector<32x512xbf16>, vector<8x512xf32> -> vector<8x512xf32>
    %30 = arith.addf %26, %29 : vector<8x512xf32>
    %31 = vector.extract_strided_slice %30 {offsets = [0, 0], sizes = [8, 32], strides = [1, 1]} : vector<8x512xf32> to vector<8x32xf32>
    %32 = arith.negf %31 : vector<8x32xf32>
    %33 = math.exp %32 : vector<8x32xf32>
    %cst_22 = arith.constant 1.000000e+00 : f32
    %34 = vector.broadcast %cst_22 : f32 to vector<8x32xf32>
    %35 = arith.addf %34, %33 : vector<8x32xf32>
    %36 = arith.divf %34, %35 : vector<8x32xf32>
    %37 = vector.extract_strided_slice %30 {offsets = [0, 128], sizes = [8, 32], strides = [1, 1]} : vector<8x512xf32> to vector<8x32xf32>
    %38 = arith.negf %37 : vector<8x32xf32>
    %39 = math.exp %38 : vector<8x32xf32>
    %cst_23 = arith.constant 1.000000e+00 : f32
    %40 = vector.broadcast %cst_23 : f32 to vector<8x32xf32>
    %41 = arith.addf %40, %39 : vector<8x32xf32>
    %42 = arith.divf %40, %41 : vector<8x32xf32>
    %43 = vector.extract_strided_slice %30 {offsets = [0, 256], sizes = [8, 32], strides = [1, 1]} : vector<8x512xf32> to vector<8x32xf32>
    %44 = math.tanh %43 : vector<8x32xf32>
    %45 = vector.extract_strided_slice %30 {offsets = [0, 384], sizes = [8, 32], strides = [1, 1]} : vector<8x512xf32> to vector<8x32xf32>
    %46 = arith.negf %45 : vector<8x32xf32>
    %47 = math.exp %46 : vector<8x32xf32>
    %cst_24 = arith.constant 1.000000e+00 : f32
    %48 = vector.broadcast %cst_24 : f32 to vector<8x32xf32>
    %49 = arith.addf %48, %47 : vector<8x32xf32>
    %50 = arith.divf %48, %49 : vector<8x32xf32>
    %c0_25 = arith.constant 0 : index
    %c0_26 = arith.constant 0 : index
    %51 = vector.load %arg6[%c0_25, %c0_26] : memref<8x32xf32, #tpu.memory_space<vmem>>, vector<8x32xf32>
    %52 = arith.mulf %42, %51 : vector<8x32xf32>
    %53 = arith.mulf %36, %44 : vector<8x32xf32>
    %54 = arith.addf %52, %53 : vector<8x32xf32>
    %55 = math.tanh %54 : vector<8x32xf32>
    %56 = arith.mulf %50, %55 : vector<8x32xf32>
    %c0_27 = arith.constant 0 : index
    %c0_28 = arith.constant 0 : index
    %57 = vector.load %arg5[%c0_27, %c0_28] : memref<8x32xf32, #tpu.memory_space<vmem>>, vector<8x32xf32>
    tpu.vector_store %arg5[%c0_27, %c0_28], %56 {strides = array<i32>} : memref<8x32xf32, #tpu.memory_space<vmem>>, vector<8x32xf32>,
    %c0_29 = arith.constant 0 : index
    %c0_30 = arith.constant 0 : index
    %58 = vector.load %arg6[%c0_29, %c0_30] : memref<8x32xf32, #tpu.memory_space<vmem>>, vector<8x32xf32>
    tpu.vector_store %arg6[%c0_29, %c0_30], %54 {strides = array<i32>} : memref<8x32xf32, #tpu.memory_space<vmem>>, vector<8x32xf32>,
    %c1_i32 = arith.constant 1 : i32
    %59 = arith.index_cast %c1_i32 : i32 to index
    %c0_31 = arith.constant 0 : index
    %c0_32 = arith.constant 0 : index
    %60 = vector.load %arg7[%59, %c0_31, %c0_32] : memref<8x8x512xf32, #tpu.memory_space<vmem>>, vector<1x8x512xf32>
    %61 = vector.shape_cast %60 : vector<1x8x512xf32> to vector<8x512xf32>
    %c0_33 = arith.constant 0 : index
    %c0_34 = arith.constant 0 : index
    %62 = vector.load %arg5[%c0_33, %c0_34] : memref<8x32xf32, #tpu.memory_space<vmem>>, vector<8x32xf32>
    %63 = arith.truncf %62 : vector<8x32xf32> to vector<8x32xbf16>
    %cst_35 = arith.constant dense<0.000000e+00> : vector<8x512xf32>
    %64 = tpu.matmul %63, %23, %cst_35 {dimension_numbers = #tpu.dot_dimension_numbers<[1], [0], [0], [1], [0, 0, 1, 1], [], []>} : vector<8x32xbf16>, vector<32x512xbf16>, vector<8x512xf32> -> vector<8x512xf32>
    %65 = arith.addf %61, %64 : vector<8x512xf32>
    %66 = vector.extract_strided_slice %65 {offsets = [0, 0], sizes = [8, 32], strides = [1, 1]} : vector<8x512xf32> to vector<8x32xf32>
    %67 = arith.negf %66 : vector<8x32xf32>
    %68 = math.exp %67 : vector<8x32xf32>
    %cst_36 = arith.constant 1.000000e+00 : f32
    %69 = vector.broadcast %cst_36 : f32 to vector<8x32xf32>
    %70 = arith.addf %69, %68 : vector<8x32xf32>
    %71 = arith.divf %69, %70 : vector<8x32xf32>
    %72 = vector.extract_strided_slice %65 {offsets = [0, 128], sizes = [8, 32], strides = [1, 1]} : vector<8x512xf32> to vector<8x32xf32>
    %73 = arith.negf %72 : vector<8x32xf32>
    %74 = math.exp %73 : vector<8x32xf32>
    %cst_37 = arith.constant 1.000000e+00 : f32
    %75 = vector.broadcast %cst_37 : f32 to vector<8x32xf32>
    %76 = arith.addf %75, %74 : vector<8x32xf32>
    %77 = arith.divf %75, %76 : vector<8x32xf32>
    %78 = vector.extract_strided_slice %65 {offsets = [0, 256], sizes = [8, 32], strides = [1, 1]} : vector<8x512xf32> to vector<8x32xf32>
    %79 = math.tanh %78 : vector<8x32xf32>
    %80 = vector.extract_strided_slice %65 {offsets = [0, 384], sizes = [8, 32], strides = [1, 1]} : vector<8x512xf32> to vector<8x32xf32>
    %81 = arith.negf %80 : vector<8x32xf32>
    %82 = math.exp %81 : vector<8x32xf32>
    %cst_38 = arith.constant 1.000000e+00 : f32
    %83 = vector.broadcast %cst_38 : f32 to vector<8x32xf32>
    %84 = arith.addf %83, %82 : vector<8x32xf32>
    %85 = arith.divf %83, %84 : vector<8x32xf32>
    %c0_39 = arith.constant 0 : index
    %c0_40 = arith.constant 0 : index
    %86 = vector.load %arg6[%c0_39, %c0_40] : memref<8x32xf32, #tpu.memory_space<vmem>>, vector<8x32xf32>
    %87 = arith.mulf %77, %86 : vector<8x32xf32>
    %88 = arith.mulf %71, %79 : vector<8x32xf32>
    %89 = arith.addf %87, %88 : vector<8x32xf32>
    %90 = math.tanh %89 : vector<8x32xf32>
    %91 = arith.mulf %85, %90 : vector<8x32xf32>
    %c0_41 = arith.constant 0 : index
    %c0_42 = arith.constant 0 : index
    %92 = vector.load %arg5[%c0_41, %c0_42] : memref<8x32xf32, #tpu.memory_space<vmem>>, vector<8x32xf32>
    tpu.vector_store %arg5[%c0_41, %c0_42], %91 {strides = array<i32>} : memref<8x32xf32, #tpu.memory_space<vmem>>, vector<8x32xf32>,
    %c0_43 = arith.constant 0 : index
    %c0_44 = arith.constant 0 : index
    %93 = vector.load %arg6[%c0_43, %c0_44] : memref<8x32xf32, #tpu.memory_space<vmem>>, vector<8x32xf32>
    tpu.vector_store %arg6[%c0_43, %c0_44], %89 {strides = array<i32>} : memref<8x32xf32, #tpu.memory_space<vmem>>, vector<8x32xf32>,
    %c2_i32 = arith.constant 2 : i32
    %94 = arith.index_cast %c2_i32 : i32 to index
    %c0_45 = arith.constant 0 : index
    %c0_46 = arith.constant 0 : index
    %95 = vector.load %arg7[%94, %c0_45, %c0_46] : memref<8x8x512xf32, #tpu.memory_space<vmem>>, vector<1x8x512xf32>
    %96 = vector.shape_cast %95 : vector<1x8x512xf32> to vector<8x512xf32>
    %c0_47 = arith.constant 0 : index
    %c0_48 = arith.constant 0 : index
    %97 = vector.load %arg5[%c0_47, %c0_48] : memref<8x32xf32, #tpu.memory_space<vmem>>, vector<8x32xf32>
    %98 = arith.truncf %97 : vector<8x32xf32> to vector<8x32xbf16>
    %cst_49 = arith.constant dense<0.000000e+00> : vector<8x512xf32>
    %99 = tpu.matmul %98, %23, %cst_49 {dimension_numbers = #tpu.dot_dimension_numbers<[1], [0], [0], [1], [0, 0, 1, 1], [], []>} : vector<8x32xbf16>, vector<32x512xbf16>, vector<8x512xf32> -> vector<8x512xf32>
    %100 = arith.addf %96, %99 : vector<8x512xf32>
    %101 = vector.extract_strided_slice %100 {offsets = [0, 0], sizes = [8, 32], strides = [1, 1]} : vector<8x512xf32> to vector<8x32xf32>
    %102 = arith.negf %101 : vector<8x32xf32>
    %103 = math.exp %102 : vector<8x32xf32>
    %cst_50 = arith.constant 1.000000e+00 : f32
    %104 = vector.broadcast %cst_50 : f32 to vector<8x32xf32>
    %105 = arith.addf %104, %103 : vector<8x32xf32>
    %106 = arith.divf %104, %105 : vector<8x32xf32>
    %107 = vector.extract_strided_slice %100 {offsets = [0, 128], sizes = [8, 32], strides = [1, 1]} : vector<8x512xf32> to vector<8x32xf32>
    %108 = arith.negf %107 : vector<8x32xf32>
    %109 = math.exp %108 : vector<8x32xf32>
    %cst_51 = arith.constant 1.000000e+00 : f32
    %110 = vector.broadcast %cst_51 : f32 to vector<8x32xf32>
    %111 = arith.addf %110, %109 : vector<8x32xf32>
    %112 = arith.divf %110, %111 : vector<8x32xf32>
    %113 = vector.extract_strided_slice %100 {offsets = [0, 256], sizes = [8, 32], strides = [1, 1]} : vector<8x512xf32> to vector<8x32xf32>
    %114 = math.tanh %113 : vector<8x32xf32>
    %115 = vector.extract_strided_slice %100 {offsets = [0, 384], sizes = [8, 32], strides = [1, 1]} : vector<8x512xf32> to vector<8x32xf32>
    %116 = arith.negf %115 : vector<8x32xf32>
    %117 = math.exp %116 : vector<8x32xf32>
    %cst_52 = arith.constant 1.000000e+00 : f32
    %118 = vector.broadcast %cst_52 : f32 to vector<8x32xf32>
    %119 = arith.addf %118, %117 : vector<8x32xf32>
    %120 = arith.divf %118, %119 : vector<8x32xf32>
    %c0_53 = arith.constant 0 : index
    %c0_54 = arith.constant 0 : index
    %121 = vector.load %arg6[%c0_53, %c0_54] : memref<8x32xf32, #tpu.memory_space<vmem>>, vector<8x32xf32>
    %122 = arith.mulf %112, %121 : vector<8x32xf32>
    %123 = arith.mulf %106, %114 : vector<8x32xf32>
    %124 = arith.addf %122, %123 : vector<8x32xf32>
    %125 = math.tanh %124 : vector<8x32xf32>
    %126 = arith.mulf %120, %125 : vector<8x32xf32>
    %c0_55 = arith.constant 0 : index
    %c0_56 = arith.constant 0 : index
    %127 = vector.load %arg5[%c0_55, %c0_56] : memref<8x32xf32, #tpu.memory_space<vmem>>, vector<8x32xf32>
    tpu.vector_store %arg5[%c0_55, %c0_56], %126 {strides = array<i32>} : memref<8x32xf32, #tpu.memory_space<vmem>>, vector<8x32xf32>,
    %c0_57 = arith.constant 0 : index
    %c0_58 = arith.constant 0 : index
    %128 = vector.load %arg6[%c0_57, %c0_58] : memref<8x32xf32, #tpu.memory_space<vmem>>, vector<8x32xf32>
    tpu.vector_store %arg6[%c0_57, %c0_58], %124 {strides = array<i32>} : memref<8x32xf32, #tpu.memory_space<vmem>>, vector<8x32xf32>,
    %c3_i32 = arith.constant 3 : i32
    %129 = arith.index_cast %c3_i32 : i32 to index
    %c0_59 = arith.constant 0 : index
    %c0_60 = arith.constant 0 : index
    %130 = vector.load %arg7[%129, %c0_59, %c0_60] : memref<8x8x512xf32, #tpu.memory_space<vmem>>, vector<1x8x512xf32>
    %131 = vector.shape_cast %130 : vector<1x8x512xf32> to vector<8x512xf32>
    %c0_61 = arith.constant 0 : index
    %c0_62 = arith.constant 0 : index
    %132 = vector.load %arg5[%c0_61, %c0_62] : memref<8x32xf32, #tpu.memory_space<vmem>>, vector<8x32xf32>
    %133 = arith.truncf %132 : vector<8x32xf32> to vector<8x32xbf16>
    %cst_63 = arith.constant dense<0.000000e+00> : vector<8x512xf32>
    %134 = tpu.matmul %133, %23, %cst_63 {dimension_numbers = #tpu.dot_dimension_numbers<[1], [0], [0], [1], [0, 0, 1, 1], [], []>} : vector<8x32xbf16>, vector<32x512xbf16>, vector<8x512xf32> -> vector<8x512xf32>
    %135 = arith.addf %131, %134 : vector<8x512xf32>
    %136 = vector.extract_strided_slice %135 {offsets = [0, 0], sizes = [8, 32], strides = [1, 1]} : vector<8x512xf32> to vector<8x32xf32>
    %137 = arith.negf %136 : vector<8x32xf32>
    %138 = math.exp %137 : vector<8x32xf32>
    %cst_64 = arith.constant 1.000000e+00 : f32
    %139 = vector.broadcast %cst_64 : f32 to vector<8x32xf32>
    %140 = arith.addf %139, %138 : vector<8x32xf32>
    %141 = arith.divf %139, %140 : vector<8x32xf32>
    %142 = vector.extract_strided_slice %135 {offsets = [0, 128], sizes = [8, 32], strides = [1, 1]} : vector<8x512xf32> to vector<8x32xf32>
    %143 = arith.negf %142 : vector<8x32xf32>
    %144 = math.exp %143 : vector<8x32xf32>
    %cst_65 = arith.constant 1.000000e+00 : f32
    %145 = vector.broadcast %cst_65 : f32 to vector<8x32xf32>
    %146 = arith.addf %145, %144 : vector<8x32xf32>
    %147 = arith.divf %145, %146 : vector<8x32xf32>
    %148 = vector.extract_strided_slice %135 {offsets = [0, 256], sizes = [8, 32], strides = [1, 1]} : vector<8x512xf32> to vector<8x32xf32>
    %149 = math.tanh %148 : vector<8x32xf32>
    %150 = vector.extract_strided_slice %135 {offsets = [0, 384], sizes = [8, 32], strides = [1, 1]} : vector<8x512xf32> to vector<8x32xf32>
    %151 = arith.negf %150 : vector<8x32xf32>
    %152 = math.exp %151 : vector<8x32xf32>
    %cst_66 = arith.constant 1.000000e+00 : f32
    %153 = vector.broadcast %cst_66 : f32 to vector<8x32xf32>
    %154 = arith.addf %153, %152 : vector<8x32xf32>
    %155 = arith.divf %153, %154 : vector<8x32xf32>
    %c0_67 = arith.constant 0 : index
    %c0_68 = arith.constant 0 : index
    %156 = vector.load %arg6[%c0_67, %c0_68] : memref<8x32xf32, #tpu.memory_space<vmem>>, vector<8x32xf32>
    %157 = arith.mulf %147, %156 : vector<8x32xf32>
    %158 = arith.mulf %141, %149 : vector<8x32xf32>
    %159 = arith.addf %157, %158 : vector<8x32xf32>
    %160 = math.tanh %159 : vector<8x32xf32>
    %161 = arith.mulf %155, %160 : vector<8x32xf32>
    %c0_69 = arith.constant 0 : index
    %c0_70 = arith.constant 0 : index
    %162 = vector.load %arg5[%c0_69, %c0_70] : memref<8x32xf32, #tpu.memory_space<vmem>>, vector<8x32xf32>
    tpu.vector_store %arg5[%c0_69, %c0_70], %161 {strides = array<i32>} : memref<8x32xf32, #tpu.memory_space<vmem>>, vector<8x32xf32>,
    %c0_71 = arith.constant 0 : index
    %c0_72 = arith.constant 0 : index
    %163 = vector.load %arg6[%c0_71, %c0_72] : memref<8x32xf32, #tpu.memory_space<vmem>>, vector<8x32xf32>
    tpu.vector_store %arg6[%c0_71, %c0_72], %159 {strides = array<i32>} : memref<8x32xf32, #tpu.memory_space<vmem>>, vector<8x32xf32>,
    %c4_i32 = arith.constant 4 : i32
    %164 = arith.index_cast %c4_i32 : i32 to index
    %c0_73 = arith.constant 0 : index
    %c0_74 = arith.constant 0 : index
    %165 = vector.load %arg7[%164, %c0_73, %c0_74] : memref<8x8x512xf32, #tpu.memory_space<vmem>>, vector<1x8x512xf32>
    %166 = vector.shape_cast %165 : vector<1x8x512xf32> to vector<8x512xf32>
    %c0_75 = arith.constant 0 : index
    %c0_76 = arith.constant 0 : index
    %167 = vector.load %arg5[%c0_75, %c0_76] : memref<8x32xf32, #tpu.memory_space<vmem>>, vector<8x32xf32>
    %168 = arith.truncf %167 : vector<8x32xf32> to vector<8x32xbf16>
    %cst_77 = arith.constant dense<0.000000e+00> : vector<8x512xf32>
    %169 = tpu.matmul %168, %23, %cst_77 {dimension_numbers = #tpu.dot_dimension_numbers<[1], [0], [0], [1], [0, 0, 1, 1], [], []>} : vector<8x32xbf16>, vector<32x512xbf16>, vector<8x512xf32> -> vector<8x512xf32>
    %170 = arith.addf %166, %169 : vector<8x512xf32>
    %171 = vector.extract_strided_slice %170 {offsets = [0, 0], sizes = [8, 32], strides = [1, 1]} : vector<8x512xf32> to vector<8x32xf32>
    %172 = arith.negf %171 : vector<8x32xf32>
    %173 = math.exp %172 : vector<8x32xf32>
    %cst_78 = arith.constant 1.000000e+00 : f32
    %174 = vector.broadcast %cst_78 : f32 to vector<8x32xf32>
    %175 = arith.addf %174, %173 : vector<8x32xf32>
    %176 = arith.divf %174, %175 : vector<8x32xf32>
    %177 = vector.extract_strided_slice %170 {offsets = [0, 128], sizes = [8, 32], strides = [1, 1]} : vector<8x512xf32> to vector<8x32xf32>
    %178 = arith.negf %177 : vector<8x32xf32>
    %179 = math.exp %178 : vector<8x32xf32>
    %cst_79 = arith.constant 1.000000e+00 : f32
    %180 = vector.broadcast %cst_79 : f32 to vector<8x32xf32>
    %181 = arith.addf %180, %179 : vector<8x32xf32>
    %182 = arith.divf %180, %181 : vector<8x32xf32>
    %183 = vector.extract_strided_slice %170 {offsets = [0, 256], sizes = [8, 32], strides = [1, 1]} : vector<8x512xf32> to vector<8x32xf32>
    %184 = math.tanh %183 : vector<8x32xf32>
    %185 = vector.extract_strided_slice %170 {offsets = [0, 384], sizes = [8, 32], strides = [1, 1]} : vector<8x512xf32> to vector<8x32xf32>
    %186 = arith.negf %185 : vector<8x32xf32>
    %187 = math.exp %186 : vector<8x32xf32>
    %cst_80 = arith.constant 1.000000e+00 : f32
    %188 = vector.broadcast %cst_80 : f32 to vector<8x32xf32>
    %189 = arith.addf %188, %187 : vector<8x32xf32>
    %190 = arith.divf %188, %189 : vector<8x32xf32>
    %c0_81 = arith.constant 0 : index
    %c0_82 = arith.constant 0 : index
    %191 = vector.load %arg6[%c0_81, %c0_82] : memref<8x32xf32, #tpu.memory_space<vmem>>, vector<8x32xf32>
    %192 = arith.mulf %182, %191 : vector<8x32xf32>
    %193 = arith.mulf %176, %184 : vector<8x32xf32>
    %194 = arith.addf %192, %193 : vector<8x32xf32>
    %195 = math.tanh %194 : vector<8x32xf32>
    %196 = arith.mulf %190, %195 : vector<8x32xf32>
    %c0_83 = arith.constant 0 : index
    %c0_84 = arith.constant 0 : index
    %197 = vector.load %arg5[%c0_83, %c0_84] : memref<8x32xf32, #tpu.memory_space<vmem>>, vector<8x32xf32>
    tpu.vector_store %arg5[%c0_83, %c0_84], %196 {strides = array<i32>} : memref<8x32xf32, #tpu.memory_space<vmem>>, vector<8x32xf32>,
    %c0_85 = arith.constant 0 : index
    %c0_86 = arith.constant 0 : index
    %198 = vector.load %arg6[%c0_85, %c0_86] : memref<8x32xf32, #tpu.memory_space<vmem>>, vector<8x32xf32>
    tpu.vector_store %arg6[%c0_85, %c0_86], %194 {strides = array<i32>} : memref<8x32xf32, #tpu.memory_space<vmem>>, vector<8x32xf32>,
    %c5_i32 = arith.constant 5 : i32
    %199 = arith.index_cast %c5_i32 : i32 to index
    %c0_87 = arith.constant 0 : index
    %c0_88 = arith.constant 0 : index
    %200 = vector.load %arg7[%199, %c0_87, %c0_88] : memref<8x8x512xf32, #tpu.memory_space<vmem>>, vector<1x8x512xf32>
    %201 = vector.shape_cast %200 : vector<1x8x512xf32> to vector<8x512xf32>
    %c0_89 = arith.constant 0 : index
    %c0_90 = arith.constant 0 : index
    %202 = vector.load %arg5[%c0_89, %c0_90] : memref<8x32xf32, #tpu.memory_space<vmem>>, vector<8x32xf32>
    %203 = arith.truncf %202 : vector<8x32xf32> to vector<8x32xbf16>
    %cst_91 = arith.constant dense<0.000000e+00> : vector<8x512xf32>
    %204 = tpu.matmul %203, %23, %cst_91 {dimension_numbers = #tpu.dot_dimension_numbers<[1], [0], [0], [1], [0, 0, 1, 1], [], []>} : vector<8x32xbf16>, vector<32x512xbf16>, vector<8x512xf32> -> vector<8x512xf32>
    %205 = arith.addf %201, %204 : vector<8x512xf32>
    %206 = vector.extract_strided_slice %205 {offsets = [0, 0], sizes = [8, 32], strides = [1, 1]} : vector<8x512xf32> to vector<8x32xf32>
    %207 = arith.negf %206 : vector<8x32xf32>
    %208 = math.exp %207 : vector<8x32xf32>
    %cst_92 = arith.constant 1.000000e+00 : f32
    %209 = vector.broadcast %cst_92 : f32 to vector<8x32xf32>
    %210 = arith.addf %209, %208 : vector<8x32xf32>
    %211 = arith.divf %209, %210 : vector<8x32xf32>
    %212 = vector.extract_strided_slice %205 {offsets = [0, 128], sizes = [8, 32], strides = [1, 1]} : vector<8x512xf32> to vector<8x32xf32>
    %213 = arith.negf %212 : vector<8x32xf32>
    %214 = math.exp %213 : vector<8x32xf32>
    %cst_93 = arith.constant 1.000000e+00 : f32
    %215 = vector.broadcast %cst_93 : f32 to vector<8x32xf32>
    %216 = arith.addf %215, %214 : vector<8x32xf32>
    %217 = arith.divf %215, %216 : vector<8x32xf32>
    %218 = vector.extract_strided_slice %205 {offsets = [0, 256], sizes = [8, 32], strides = [1, 1]} : vector<8x512xf32> to vector<8x32xf32>
    %219 = math.tanh %218 : vector<8x32xf32>
    %220 = vector.extract_strided_slice %205 {offsets = [0, 384], sizes = [8, 32], strides = [1, 1]} : vector<8x512xf32> to vector<8x32xf32>
    %221 = arith.negf %220 : vector<8x32xf32>
    %222 = math.exp %221 : vector<8x32xf32>
    %cst_94 = arith.constant 1.000000e+00 : f32
    %223 = vector.broadcast %cst_94 : f32 to vector<8x32xf32>
    %224 = arith.addf %223, %222 : vector<8x32xf32>
    %225 = arith.divf %223, %224 : vector<8x32xf32>
    %c0_95 = arith.constant 0 : index
    %c0_96 = arith.constant 0 : index
    %226 = vector.load %arg6[%c0_95, %c0_96] : memref<8x32xf32, #tpu.memory_space<vmem>>, vector<8x32xf32>
    %227 = arith.mulf %217, %226 : vector<8x32xf32>
    %228 = arith.mulf %211, %219 : vector<8x32xf32>
    %229 = arith.addf %227, %228 : vector<8x32xf32>
    %230 = math.tanh %229 : vector<8x32xf32>
    %231 = arith.mulf %225, %230 : vector<8x32xf32>
    %c0_97 = arith.constant 0 : index
    %c0_98 = arith.constant 0 : index
    %232 = vector.load %arg5[%c0_97, %c0_98] : memref<8x32xf32, #tpu.memory_space<vmem>>, vector<8x32xf32>
    tpu.vector_store %arg5[%c0_97, %c0_98], %231 {strides = array<i32>} : memref<8x32xf32, #tpu.memory_space<vmem>>, vector<8x32xf32>,
    %c0_99 = arith.constant 0 : index
    %c0_100 = arith.constant 0 : index
    %233 = vector.load %arg6[%c0_99, %c0_100] : memref<8x32xf32, #tpu.memory_space<vmem>>, vector<8x32xf32>
    tpu.vector_store %arg6[%c0_99, %c0_100], %229 {strides = array<i32>} : memref<8x32xf32, #tpu.memory_space<vmem>>, vector<8x32xf32>,
    %c6_i32 = arith.constant 6 : i32
    %234 = arith.index_cast %c6_i32 : i32 to index
    %c0_101 = arith.constant 0 : index
    %c0_102 = arith.constant 0 : index
    %235 = vector.load %arg7[%234, %c0_101, %c0_102] : memref<8x8x512xf32, #tpu.memory_space<vmem>>, vector<1x8x512xf32>
    %236 = vector.shape_cast %235 : vector<1x8x512xf32> to vector<8x512xf32>
    %c0_103 = arith.constant 0 : index
    %c0_104 = arith.constant 0 : index
    %237 = vector.load %arg5[%c0_103, %c0_104] : memref<8x32xf32, #tpu.memory_space<vmem>>, vector<8x32xf32>
    %238 = arith.truncf %237 : vector<8x32xf32> to vector<8x32xbf16>
    %cst_105 = arith.constant dense<0.000000e+00> : vector<8x512xf32>
    %239 = tpu.matmul %238, %23, %cst_105 {dimension_numbers = #tpu.dot_dimension_numbers<[1], [0], [0], [1], [0, 0, 1, 1], [], []>} : vector<8x32xbf16>, vector<32x512xbf16>, vector<8x512xf32> -> vector<8x512xf32>
    %240 = arith.addf %236, %239 : vector<8x512xf32>
    %241 = vector.extract_strided_slice %240 {offsets = [0, 0], sizes = [8, 32], strides = [1, 1]} : vector<8x512xf32> to vector<8x32xf32>
    %242 = arith.negf %241 : vector<8x32xf32>
    %243 = math.exp %242 : vector<8x32xf32>
    %cst_106 = arith.constant 1.000000e+00 : f32
    %244 = vector.broadcast %cst_106 : f32 to vector<8x32xf32>
    %245 = arith.addf %244, %243 : vector<8x32xf32>
    %246 = arith.divf %244, %245 : vector<8x32xf32>
    %247 = vector.extract_strided_slice %240 {offsets = [0, 128], sizes = [8, 32], strides = [1, 1]} : vector<8x512xf32> to vector<8x32xf32>
    %248 = arith.negf %247 : vector<8x32xf32>
    %249 = math.exp %248 : vector<8x32xf32>
    %cst_107 = arith.constant 1.000000e+00 : f32
    %250 = vector.broadcast %cst_107 : f32 to vector<8x32xf32>
    %251 = arith.addf %250, %249 : vector<8x32xf32>
    %252 = arith.divf %250, %251 : vector<8x32xf32>
    %253 = vector.extract_strided_slice %240 {offsets = [0, 256], sizes = [8, 32], strides = [1, 1]} : vector<8x512xf32> to vector<8x32xf32>
    %254 = math.tanh %253 : vector<8x32xf32>
    %255 = vector.extract_strided_slice %240 {offsets = [0, 384], sizes = [8, 32], strides = [1, 1]} : vector<8x512xf32> to vector<8x32xf32>
    %256 = arith.negf %255 : vector<8x32xf32>
    %257 = math.exp %256 : vector<8x32xf32>
    %cst_108 = arith.constant 1.000000e+00 : f32
    %258 = vector.broadcast %cst_108 : f32 to vector<8x32xf32>
    %259 = arith.addf %258, %257 : vector<8x32xf32>
    %260 = arith.divf %258, %259 : vector<8x32xf32>
    %c0_109 = arith.constant 0 : index
    %c0_110 = arith.constant 0 : index
    %261 = vector.load %arg6[%c0_109, %c0_110] : memref<8x32xf32, #tpu.memory_space<vmem>>, vector<8x32xf32>
    %262 = arith.mulf %252, %261 : vector<8x32xf32>
    %263 = arith.mulf %246, %254 : vector<8x32xf32>
    %264 = arith.addf %262, %263 : vector<8x32xf32>
    %265 = math.tanh %264 : vector<8x32xf32>
    %266 = arith.mulf %260, %265 : vector<8x32xf32>
    %c0_111 = arith.constant 0 : index
    %c0_112 = arith.constant 0 : index
    %267 = vector.load %arg5[%c0_111, %c0_112] : memref<8x32xf32, #tpu.memory_space<vmem>>, vector<8x32xf32>
    tpu.vector_store %arg5[%c0_111, %c0_112], %266 {strides = array<i32>} : memref<8x32xf32, #tpu.memory_space<vmem>>, vector<8x32xf32>,
    %c0_113 = arith.constant 0 : index
    %c0_114 = arith.constant 0 : index
    %268 = vector.load %arg6[%c0_113, %c0_114] : memref<8x32xf32, #tpu.memory_space<vmem>>, vector<8x32xf32>
    tpu.vector_store %arg6[%c0_113, %c0_114], %264 {strides = array<i32>} : memref<8x32xf32, #tpu.memory_space<vmem>>, vector<8x32xf32>,
    %c7_i32 = arith.constant 7 : i32
    %269 = arith.index_cast %c7_i32 : i32 to index
    %c0_115 = arith.constant 0 : index
    %c0_116 = arith.constant 0 : index
    %270 = vector.load %arg7[%269, %c0_115, %c0_116] : memref<8x8x512xf32, #tpu.memory_space<vmem>>, vector<1x8x512xf32>
    %271 = vector.shape_cast %270 : vector<1x8x512xf32> to vector<8x512xf32>
    %c0_117 = arith.constant 0 : index
    %c0_118 = arith.constant 0 : index
    %272 = vector.load %arg5[%c0_117, %c0_118] : memref<8x32xf32, #tpu.memory_space<vmem>>, vector<8x32xf32>
    %273 = arith.truncf %272 : vector<8x32xf32> to vector<8x32xbf16>
    %cst_119 = arith.constant dense<0.000000e+00> : vector<8x512xf32>
    %274 = tpu.matmul %273, %23, %cst_119 {dimension_numbers = #tpu.dot_dimension_numbers<[1], [0], [0], [1], [0, 0, 1, 1], [], []>} : vector<8x32xbf16>, vector<32x512xbf16>, vector<8x512xf32> -> vector<8x512xf32>
    %275 = arith.addf %271, %274 : vector<8x512xf32>
    %276 = vector.extract_strided_slice %275 {offsets = [0, 0], sizes = [8, 32], strides = [1, 1]} : vector<8x512xf32> to vector<8x32xf32>
    %277 = arith.negf %276 : vector<8x32xf32>
    %278 = math.exp %277 : vector<8x32xf32>
    %cst_120 = arith.constant 1.000000e+00 : f32
    %279 = vector.broadcast %cst_120 : f32 to vector<8x32xf32>
    %280 = arith.addf %279, %278 : vector<8x32xf32>
    %281 = arith.divf %279, %280 : vector<8x32xf32>
    %282 = vector.extract_strided_slice %275 {offsets = [0, 128], sizes = [8, 32], strides = [1, 1]} : vector<8x512xf32> to vector<8x32xf32>
    %283 = arith.negf %282 : vector<8x32xf32>
    %284 = math.exp %283 : vector<8x32xf32>
    %cst_121 = arith.constant 1.000000e+00 : f32
    %285 = vector.broadcast %cst_121 : f32 to vector<8x32xf32>
    %286 = arith.addf %285, %284 : vector<8x32xf32>
    %287 = arith.divf %285, %286 : vector<8x32xf32>
    %288 = vector.extract_strided_slice %275 {offsets = [0, 256], sizes = [8, 32], strides = [1, 1]} : vector<8x512xf32> to vector<8x32xf32>
    %289 = math.tanh %288 : vector<8x32xf32>
    %290 = vector.extract_strided_slice %275 {offsets = [0, 384], sizes = [8, 32], strides = [1, 1]} : vector<8x512xf32> to vector<8x32xf32>
    %291 = arith.negf %290 : vector<8x32xf32>
    %292 = math.exp %291 : vector<8x32xf32>
    %cst_122 = arith.constant 1.000000e+00 : f32
    %293 = vector.broadcast %cst_122 : f32 to vector<8x32xf32>
    %294 = arith.addf %293, %292 : vector<8x32xf32>
    %295 = arith.divf %293, %294 : vector<8x32xf32>
    %c0_123 = arith.constant 0 : index
    %c0_124 = arith.constant 0 : index
    %296 = vector.load %arg6[%c0_123, %c0_124] : memref<8x32xf32, #tpu.memory_space<vmem>>, vector<8x32xf32>
    %297 = arith.mulf %287, %296 : vector<8x32xf32>
    %298 = arith.mulf %281, %289 : vector<8x32xf32>
    %299 = arith.addf %297, %298 : vector<8x32xf32>
    %300 = math.tanh %299 : vector<8x32xf32>
    %301 = arith.mulf %295, %300 : vector<8x32xf32>
    %c0_125 = arith.constant 0 : index
    %c0_126 = arith.constant 0 : index
    %302 = vector.load %arg5[%c0_125, %c0_126] : memref<8x32xf32, #tpu.memory_space<vmem>>, vector<8x32xf32>
    tpu.vector_store %arg5[%c0_125, %c0_126], %301 {strides = array<i32>} : memref<8x32xf32, #tpu.memory_space<vmem>>, vector<8x32xf32>,
    %c0_127 = arith.constant 0 : index
    %c0_128 = arith.constant 0 : index
    %303 = vector.load %arg6[%c0_127, %c0_128] : memref<8x32xf32, #tpu.memory_space<vmem>>, vector<8x32xf32>
    tpu.vector_store %arg6[%c0_127, %c0_128], %299 {strides = array<i32>} : memref<8x32xf32, #tpu.memory_space<vmem>>, vector<8x32xf32>,
    %c8_i32 = arith.constant 8 : i32
    return
  }
  func.func @transform_0(%arg0: i32) -> (i32, i32, i32) {
    %c0_i32 = arith.constant 0 : i32
    %c0_i32_0 = arith.constant 0 : i32
    %c0_i32_1 = arith.constant 0 : i32
    return %c0_i32, %arg0, %c0_i32_0 : i32, i32, i32
  }
  func.func @transform_1(%arg0: i32) -> (i32, i32) {
    %c0_i32 = arith.constant 0 : i32
    %c0_i32_0 = arith.constant 0 : i32
    %c0_i32_1 = arith.constant 0 : i32
    return %c0_i32, %c0_i32_0 : i32, i32
  }
  func.func @transform_2(%arg0: i32) -> (i32, i32) {
    %c0_i32 = arith.constant 0 : i32
    %c0_i32_0 = arith.constant 0 : i32
    %c0_i32_1 = arith.constant 0 : i32
    return %c0_i32, %c0_i32_0 : i32, i32
  }
  func.func @transform_3(%arg0: i32) -> (i32, i32) {
    %c0_i32 = arith.constant 0 : i32
    %c0_i32_0 = arith.constant 0 : i32
    %c0_i32_1 = arith.constant 0 : i32
    return %c0_i32, %c0_i32_0 : i32, i32
  }
  func.func @transform_4(%arg0: i32) -> (i32, i32) {
    %c0_i32 = arith.constant 0 : i32
    %c0_i32_0 = arith.constant 0 : i32
    return %arg0, %c0_i32 : i32, i32
  }
}

</mosaic_0001>

<bundles_post_ra>
// kernel: tpu_custom_call.1
= control target key start
LH: loop header
LB: loop body
LE: loop exit
PB: predicated region body
PF: predicated region fallthrough
CT: control target
= control target key end

     0   :  { %vm326_vm0 = vcmask 261120   ;;  %v2090_v2 = vmov 0   ;;  %v1603_v5 = vmov 0.0   ;;  %s2085_s0 = inlined_call_operand.vmem [shape: f32[8,8,2], index: 0, kind: input, shape index: {}]   ;;  %s2086_s1 = inlined_call_operand.vmem [shape: f32[2,512], index: 1, kind: input, shape index: {}]   ;;  %s2087_s2 = inlined_call_operand.vmem [shape: f32[1,512], index: 2, kind: input, shape index: {}]   ;;  %s2088_s3 = inlined_call_operand.vmem [shape: bf16[32,512], index: 3, kind: input, shape index: {}]   ;;  %s2089_s4 = inlined_call_operand.hbm [shape: f32[8,32], index: 4, kind: output, shape index: {}]  }
   0x1   :  { %v1634_v0 = vld [vmem:[%s2088_s3 + $0x4] ss:$16 sps:$4 sm:$0xff]   ;;  %v1639_v1 = vld [vmem:[%s2088_s3 + $0xc] ss:$16 sps:$4 sm:$0xff]   ;;  %418 = vmatprep.mubr.bf16.mxu0 %v2090_v2  ;;  %459 = vmatprep.mubr.bf16.mxu1 %v2090_v2  ;;  %v1647_v3 = vld [vmem:[%s2088_s3] ss:$16 sps:$4 sm:$0xff]  }
   0x2   :  { %386 = vmatprep.subr.bf16.mxu0 %v1634_v0  ;;  %v1652_v4 = vld [vmem:[%s2088_s3 + $0x8] ss:$16 sps:$4 sm:$0xff]   ;;  %327 = vst.msk [vmem:[#allocation4] sm:$0xff] %vm326_vm0, %v1603_v5  ;;  %328 = vst.msk [vmem:[#allocation2] sm:$0xff] %vm326_vm0, %v1603_v5  ;;  %1429 = vset.pattern.permute.xlu1 %v2090_v2  ;;  %v1661_v6 = vld [vmem:[%s2088_s3 + $0x24] ss:$16 sps:$4 sm:$0xff]  }
   0x3   :  { %427 = vmatprep.subr.bf16.mxu1 %v1639_v1  ;;  %1427 = vset.pattern.permute.xlu0 %v2090_v2  ;;  %v1669_v7 = vld [vmem:[%s2088_s3 + $0x2c] ss:$16 sps:$4 sm:$0xff]   ;;  %v1674_v8 = vld [vmem:[%s2088_s3 + $0x20] ss:$16 sps:$4 sm:$0xff]   ;;  %v1680_v9 = vld [vmem:[%s2088_s3 + $0x28] ss:$16 sps:$4 sm:$0xff]  }
   0x4   :  { %387 = vmatpush1.bf16.msra.mxu0 %v1647_v3  ;;  %428 = vmatpush1.bf16.msra.mxu1 %v1652_v4  ;;  %v20_v10 = vld [vmem:[%s2085_s0 + $0x8] sm:$0xff]  ;;  %v19_v11 = vld [vmem:[%s2085_s0] sm:$0xff] }
   0x5   :  { %388 = vmatprep.subr.bf16.mxu0 %v1661_v6  ;;  %429 = vmatprep.subr.bf16.mxu1 %v1669_v7 }
   0x6   :  { %38 = vperm.xlu1 %1429, %v20_v10   ;;  %33 = vperm.xlu0 %1427, %v19_v11  }
   0x8   :  { %389 = vmatpush1.bf16.msra.mxu0 %v1674_v8  ;;  %430 = vmatpush1.bf16.msra.mxu1 %v1680_v9 }
   0x9   :  { %v341_v12 = vld [vmem:[#allocation4] sm:$0xff]  ;;  %509 = vmatprep.subr.bf16.mxu0 %v1634_v0 }
   0xa   :  { %9 = vsyncpa [#allocation5], 0  ;;  %v342_v13 = vpack.c.bf16 %v341_v12, %v341_v12  ;;  %v1604_v14 = vmov 1   ;;  %v21_v15 = vld [vmem:[%s2085_s0 + $0x10] sm:$0xff]  ;;  %550 = vmatprep.subr.bf16.mxu1 %v1639_v1  ;;  %v22_v16 = vld [vmem:[%s2085_s0 + $0x18] sm:$0xff]  ;;  %v72_v21 = vlaneseq }
   0xb   :  { %1430 = vset.pattern.permute.xlu1 %v1604_v14  ;;  %1428 = vset.pattern.permute.xlu0 %v1604_v14  ;;  %v23_v17 = vld [vmem:[%s2085_s0 + $0x20] sm:$0xff]  ;;  %v24_v18 = vld [vmem:[%s2085_s0 + $0x28] sm:$0xff]  ;;  %v25_v19 = vld [vmem:[%s2085_s0 + $0x30] sm:$0xff] }
   0xc   :  { %129 = vperm.xlu1 %1430, %v20_v10   ;;  %1383 = vmatmul.mubr.msk.bf16.vlgmr.msra.gmra.mrb[0].mxu0 %vm326_vm0, %v342_v13  ;;  %v26_v20 = vld [vmem:[%s2085_s0 + $0x38] sm:$0xff]  ;;  %v73_v23 = vshrl.u32 %v72_v21, 7  ;;  %v27_v30 = vld [vmem:[%s2086_s1] ss:$2 sm:$0xf] }
   0xd   :  { %1384 = vmatmul.mubr.msk.bf16.vlgmr.msra.gmra.mrb[0].mxu1 %vm326_vm0, %v342_v13  ;;  %125 = vperm.xlu0 %1428, %v19_v11   ;;  %v1374_v31 = vld [vmem:[%s2086_s1 + $0x1] ss:$2 sm:$0xf] }
   0xe   :  { %510 = vmatpush1.bf16.msra.mxu0 %v1647_v3  ;;  %551 = vmatpush1.bf16.msra.mxu1 %v1652_v4  ;;  %v74_v25 = vsub.s32 0, %v73_v23  ;;  %v1728_v26 = vsub.s32 1, %v73_v23  ;;  %v1730_v27 = vsub.s32 2, %v73_v23  ;;  %v1732_v28 = vsub.s32 3, %v73_v23  ;;  %v1769_v42 = vld [vmem:[%s2087_s2] sm:$0xf] }
   0xf   :  { %511 = vmatprep.subr.bf16.mxu0 %v1661_v6  ;;  %552 = vmatprep.subr.bf16.mxu1 %v1669_v7 }
  0x10   :  { %1431 = vset.pattern.permute.xlu1 %v2090_v2  ;;  %541 = vmatprep.mubr.bf16.mxu0 %v2090_v2  ;;  %v1744_v33 = vrot.slane %v27_v30, %v74_v25  ;;  %v1747_v34 = vrot.slane %v27_v30, %v1728_v26  ;;  %v1750_v35 = vrot.slane %v27_v30, %v1730_v27 }
  0x11   :  { %43 = vperm.xlu1 %1431, %v21_v15   ;;  %133 = vperm.xlu0 %1428, %v21_v15   ;;  %v1753_v36 = vrot.slane %v27_v30, %v1732_v28  ;;  %v1755_v37 = vrot.slane %v1374_v31, %v74_v25  ;;  %v1758_v38 = vrot.slane %v1374_v31, %v1728_v26 }
  0x12   :  { %512 = vmatpush1.bf16.msra.mxu0 %v1674_v8  ;;  %582 = vmatprep.mubr.bf16.mxu1 %v2090_v2  ;;  %v1761_v39 = vrot.slane %v1374_v31, %v1730_v27  ;;  %v1764_v40 = vrot.slane %v1374_v31, %v1732_v28  ;;  %v1780_v52 = vrot.slane %v1769_v42, %v74_v25 }
  0x13   :  { %553 = vmatpush1.bf16.msra.mxu1 %v1680_v9  ;;  %632 = vmatprep.subr.bf16.mxu0 %v1634_v0 }
  0x14   :  { %673 = vmatprep.subr.bf16.mxu1 %v1639_v1 }
  0x15   :  { %48 = vperm.xlu1 %1431, %v22_v16   ;;  %137 = vperm.xlu0 %1428, %v22_v16  }
  0x19   :  { %53 = vperm.xlu1 %1431, %v23_v17   ;;  %141 = vperm.xlu0 %1428, %v23_v17  }
  0x1d   :  { %58 = vperm.xlu1 %1431, %v24_v18   ;;  %145 = vperm.xlu0 %1428, %v24_v18  }
  0x21   :  { %63 = vperm.xlu1 %1431, %v25_v19   ;;  %149 = vperm.xlu0 %1428, %v25_v19  }
  0x25   :  { %68 = vperm.xlu1 %1431, %v26_v20   ;;  %153 = vperm.xlu0 %1428, %v26_v20  }
  0x85   :  { %v1724_v22 = vpop.permute.xlu1 %38  ;;  %v1726_v24 = vpop.permute.xlu0 %33 }
  0x86   :  { %v96_v12 = vmul.f32 %v1744_v33, %v1724_v22  ;;  %v92_v2 = vmul.f32 %v1744_v33, %v1726_v24 }
  0x8b   :  { %v1734_v29 = vpop.permute.xlu1 %129 }
  0x8c   :  { %v1742_v32 = vpop.permute.xlu0 %125  ;;  %v181_v13 = vmul.f32 %v1755_v37, %v1734_v29 }
  0x90   :  { %v44_v41 = vpop.permute.xlu1 %43  ;;  %v134_v47 = vpop.permute.xlu0 %133 }
  0x91   :  { %v100_v43 = vmul.f32 %v1744_v33, %v44_v41  ;;  %v101_v44 = vmul.f32 %v1747_v34, %v44_v41  ;;  %v102_v45 = vmul.f32 %v1750_v35, %v44_v41  ;;  %v103_v46 = vmul.f32 %v1753_v36, %v44_v41 }
  0x92   :  { %v185_v48 = vmul.f32 %v1755_v37, %v134_v47  ;;  %v186_v49 = vmul.f32 %v1758_v38, %v134_v47  ;;  %v187_v50 = vmul.f32 %v1761_v39, %v134_v47  ;;  %v188_v51 = vmul.f32 %v1764_v40, %v134_v47 }
  0x94   :  { %v49_v53 = vpop.permute.xlu1 %48  ;;  %v217_v54 = vadd.f32 %v185_v48, %v100_v43  ;;  %v1782_v55 = vadd.f32 %v187_v50, %v102_v45  ;;  %v1784_v56 = vadd.f32 %v186_v49, %v101_v44  ;;  %v1786_v57 = vadd.f32 %v188_v51, %v103_v46  ;;  %v138_v62 = vpop.permute.xlu0 %137 }
  0x95   :  { %v104_v58 = vmul.f32 %v1744_v33, %v49_v53  ;;  %v105_v59 = vmul.f32 %v1747_v34, %v49_v53  ;;  %v106_v60 = vmul.f32 %v1750_v35, %v49_v53  ;;  %v107_v61 = vmul.f32 %v1753_v36, %v49_v53 }
  0x96   :  { %v189_v63 = vmul.f32 %v1755_v37, %v138_v62  ;;  %v190_v5 = vmul.f32 %v1758_v38, %v138_v62  ;;  %v191_v10 = vmul.f32 %v1761_v39, %v138_v62  ;;  %v192_v11 = vmul.f32 %v1764_v40, %v138_v62 }
  0x97   :  { %v1801_v14 = vadd.f32 %v1780_v52, %v217_v54  ;;  %v213_v44 = vadd.f32 %v181_v13, %v96_v12 }
  0x98   :  { %v54_v15 = vpop.permute.xlu1 %53  ;;  %v221_v16 = vadd.f32 %v189_v63, %v104_v58  ;;  %v1803_v17 = vadd.f32 %v191_v10, %v106_v60  ;;  %v1805_v18 = vadd.f32 %v190_v5, %v105_v59  ;;  %v1807_v19 = vadd.f32 %v192_v11, %v107_v61  ;;  %v142_v25 = vpop.permute.xlu0 %141 }
  0x99   :  { %v108_v20 = vmul.f32 %v1744_v33, %v54_v15  ;;  %v109_v21 = vmul.f32 %v1747_v34, %v54_v15  ;;  %v110_v23 = vmul.f32 %v1750_v35, %v54_v15  ;;  %v193_v30 = vmul.f32 %v1755_v37, %v142_v25 }
  0x9a   :  { %v194_v31 = vmul.f32 %v1758_v38, %v142_v25  ;;  %v195_v41 = vmul.f32 %v1761_v39, %v142_v25  ;;  %v111_v43 = vmul.f32 %v1753_v36, %v54_v15  ;;  %v1817_v45 = vadd.f32 %v1780_v52, %v221_v16 }
  0x9b   :  { %v196_v46 = vmul.f32 %v1764_v40, %v142_v25  ;;  %v225_v48 = vadd.f32 %v193_v30, %v108_v20  ;;  %v1833_v5 = vadd.f32 %v1780_v52, %v213_v44 }
  0x9c   :  { %v59_v47 = vpop.permute.xlu1 %58  ;;  %v1820_v49 = vadd.f32 %v195_v41, %v110_v23  ;;  %v1822_v50 = vadd.f32 %v194_v31, %v109_v21  ;;  %v146_v58 = vpop.permute.xlu0 %145 }
  0x9d   :  { %v112_v51 = vmul.f32 %v1744_v33, %v59_v47  ;;  %v113_v53 = vmul.f32 %v1747_v34, %v59_v47  ;;  %v114_v54 = vmul.f32 %v1750_v35, %v59_v47  ;;  %v197_v59 = vmul.f32 %v1755_v37, %v146_v58 }
  0x9e   :  { %v198_v60 = vmul.f32 %v1758_v38, %v146_v58  ;;  %v199_v61 = vmul.f32 %v1761_v39, %v146_v58  ;;  %v115_v62 = vmul.f32 %v1753_v36, %v59_v47  ;;  %v200_v63 = vmul.f32 %v1764_v40, %v146_v58 }
  0x9f   :  { %v1836_v10 = vadd.f32 %v1780_v52, %v225_v48  ;;  %v1838_v12 = vadd.f32 %v196_v46, %v111_v43  ;;  %v229_v13 = vadd.f32 %v197_v59, %v112_v51 }
  0xa0   :  { %v64_v11 = vpop.permute.xlu1 %63  ;;  %v1840_v15 = vadd.f32 %v199_v61, %v114_v54  ;;  %v1842_v16 = vadd.f32 %v198_v60, %v113_v53  ;;  %v150_v25 = vpop.permute.xlu0 %149  ;;  %v1855_v48 = vadd.f32 %v200_v63, %v115_v62 }
  0xa1   :  { %v116_v20 = vmul.f32 %v1744_v33, %v64_v11  ;;  %v117_v21 = vmul.f32 %v1747_v34, %v64_v11  ;;  %v118_v23 = vmul.f32 %v1750_v35, %v64_v11  ;;  %v201_v30 = vmul.f32 %v1755_v37, %v150_v25 }
  0xa2   :  { %v202_v31 = vmul.f32 %v1758_v38, %v150_v25  ;;  %v203_v41 = vmul.f32 %v1761_v39, %v150_v25  ;;  %v119_v43 = vmul.f32 %v1753_v36, %v64_v11  ;;  %v204_v44 = vmul.f32 %v1764_v40, %v150_v25 }
  0xa3   :  { %v1853_v46 = vadd.f32 %v1780_v52, %v229_v13  ;;  %v233_v51 = vadd.f32 %v201_v30, %v116_v20 }
  0xa4   :  { %v69_v47 = vpop.permute.xlu1 %68  ;;  %v1857_v53 = vadd.f32 %v203_v41, %v118_v23  ;;  %v1859_v54 = vadd.f32 %v202_v31, %v117_v21  ;;  %v154_v11 = vpop.permute.xlu0 %153  ;;  %v1872_v21 = vadd.f32 %v204_v44, %v119_v43  ;;  %v93_v43 = vmul.f32 %v1747_v34, %v1726_v24 }
  0xa5   :  { %v120_v58 = vmul.f32 %v1744_v33, %v69_v47  ;;  %v121_v59 = vmul.f32 %v1747_v34, %v69_v47  ;;  %v122_v60 = vmul.f32 %v1750_v35, %v69_v47  ;;  %v123_v61 = vmul.f32 %v1753_v36, %v69_v47 }
  0xa6   :  { %v205_v13 = vmul.f32 %v1755_v37, %v154_v11  ;;  %v206_v25 = vmul.f32 %v1758_v38, %v154_v11  ;;  %v207_v62 = vmul.f32 %v1761_v39, %v154_v11  ;;  %v208_v63 = vmul.f32 %v1764_v40, %v154_v11 }
  0xa7   :  { %v1870_v20 = vadd.f32 %v1780_v52, %v233_v51  ;;  %v177_v11 = vmul.f32 %v1755_v37, %v1742_v32  ;;  %v178_v44 = vmul.f32 %v1758_v38, %v1742_v32  ;;  %v180_v33 = vmul.f32 %v1764_v40, %v1742_v32 }
  0xa8   :  { %v237_v23 = vadd.f32 %v205_v13, %v120_v58  ;;  %v1874_v30 = vadd.f32 %v207_v62, %v122_v60  ;;  %v1876_v31 = vadd.f32 %v206_v25, %v121_v59  ;;  %v1878_v41 = vadd.f32 %v208_v63, %v123_v61 }
  0xa9   :  { %v209_v51 = vadd.f32 %v177_v11, %v92_v2  ;;  %v210_v58 = vadd.f32 %v178_v44, %v93_v43  ;;  %v1893_v59 = vrot.slane %v1769_v42, %v1728_v26  ;;  %v95_v60 = vmul.f32 %v1753_v36, %v1726_v24 }
  0xaa   :  { %2092 = vst [vmem:[#allocation7_spill] sm:$0xff] %v1878_v41  ;;  %v1881_v47 = vadd.f32 %v1780_v52, %v237_v23  ;;  %v1903_v26 = vrot.slane %v1769_v42, %v1732_v28  ;;  %v1912_v28 = vrot.slane %v1769_v42, %v1730_v27 }
  0xab   :  { %v262_v37 = vadd.f32 %v1780_v52, %v209_v51  ;;  %v263_v25 = vadd.f32 %v1893_v59, %v210_v58  ;;  %v212_v11 = vadd.f32 %v180_v33, %v95_v60  ;;  %v179_v52 = vmul.f32 %v1761_v39, %v1742_v32 }
  0xac   :  { %2093 = vst [vmem:[#allocation8_spill] sm:$0xff] %v1881_v47  ;;  %v94_v47 = vmul.f32 %v1750_v35, %v1726_v24 }
  0xad   :  { %v265_v60 = vadd.f32 %v1903_v26, %v212_v11 }
  0xae   :  { %v211_v33 = vadd.f32 %v179_v52, %v94_v47  ;;  %v491_v47 = vld [vmem:[#allocation2] sm:$0xff] }
  0xdf   :  { %v420_v61 = vpop.f32.mrb[0].mxu0 }
  0xe0   :  { %v461_v13 = vpop.f32.mrb[0].mxu1  ;;  %v468_v62 = vadd.f32 %v420_v61, %v262_v37  ;;  %v422_v63 = vpop.f32.mrb[1].mxu0 }
  0xe1   :  { %v463_v2 = vpop.f32.mrb[1].mxu1  ;;  %v469_v23 = vadd.f32 %v422_v63, %v263_v25  ;;  %v424_v43 = vpop.f32.mrb[2].mxu0  ;;  %v264_v25 = vadd.f32 %v1912_v28, %v211_v33 }
  0xe2   :  { %v465_v44 = vpop.f32.mrb[2].mxu1  ;;  %v1385_v51 = vmul.f32 -1.442695, %v468_v62  ;;  %v425_v41 = vpop.f32.mrb[3].mxu0  ;;  %v471_v61 = vadd.f32 %v463_v2, %v265_v60 }
  0xe3   :  { %v466_v58 = vpop.f32.mrb[3].mxu1  ;;  %v1386_v37 = vmul.f32 -1.442695, %v469_v23  ;;  %v470_v63 = vadd.f32 %v461_v13, %v264_v25  ;;  %v97_v25 = vmul.f32 %v1747_v34, %v1724_v22 }
  0xe4   :  { %1444 = vpow2.f32 %v1385_v51  ;;  %v1387_v24 = vmul.f32 -1.442695, %v471_v61  ;;  %v2094_v61 = vmov 0  }
  0xe5   :  { %1446 = vpow2.f32 %v1386_v37 }
  0xe6   :  { %1448 = vpow2.f32 %v1387_v24  ;;  %v98_v24 = vmul.f32 %v1750_v35, %v1724_v22 }
  0xe7   :  { %1450 = vtanh.f32 %v470_v63  ;;  %v99_v63 = vmul.f32 %v1753_v36, %v1724_v22 }
  0xee   :  { %v1445_v43 = vpop.eup %1444 }
  0xef   :  { %v1447_v32 = vpop.eup %1446  ;;  %v475_v62 = vadd.f32 1.0, %v1445_v43  ;;  %v182_v43 = vmul.f32 %v1758_v38, %v1734_v29 }
  0xf0   :  { %v481_v41 = vadd.f32 1.0, %v1447_v32  ;;  %v1449_v23 = vpop.eup %1448  ;;  %v183_v32 = vmul.f32 %v1761_v39, %v1734_v29 }
  0xf1   :  { %1452 = vrcp.f32 %v475_v62  ;;  %v1451_v11 = vpop.eup %1450  ;;  %v488_v42 = vadd.f32 1.0, %v1449_v23  ;;  %v184_v62 = vmul.f32 %v1764_v40, %v1734_v29  ;;  %v214_v23 = vadd.f32 %v182_v43, %v97_v25 }
  0xf2   :  { %1454 = vrcp.f32 %v481_v41  ;;  %v215_v41 = vadd.f32 %v183_v32, %v98_v24 }
  0xf3   :  { %1456 = vrcp.f32 %v488_v42  ;;  %v267_v35 = vadd.f32 %v1893_v59, %v214_v23 }
  0xf4   :  { %v268_v34 = vadd.f32 %v1912_v28, %v215_v41 }
  0xfb   :  { %v1453_v44 = vpop.eup %1452 }
  0xfc   :  { %v1455_v52 = vpop.eup %1454  ;;  %v493_v27 = vmul.f32 %v1453_v44, %v1451_v11  ;;  %v216_v11 = vadd.f32 %v184_v62, %v99_v63 }
  0xfd   :  { %v492_v2 = vmul.f32 %v1455_v52, %v491_v47  ;;  %v1457_v13 = vpop.eup %1456 }
  0xfe   :  { %v269_v22 = vadd.f32 %v1903_v26, %v216_v11 }
  0xff   :  { %v494_v51 = vadd.f32 %v493_v27, %v492_v2 }
 0x101   :  { %1458 = vtanh.f32 %v494_v51  ;;  %498 = vst.msk [vmem:[#allocation2] sm:$0xff] %vm326_vm0, %v494_v51 }
 0x108   :  { %v614_v41 = vld [vmem:[#allocation2] sm:$0xff] }
 0x10b   :  { %v1459_v58 = vpop.eup %1458 }
 0x10c   :  { %v496_v37 = vmul.f32 %v1459_v58, %v1457_v13 }
 0x10e   :  { %497 = vst.msk [vmem:[#allocation4] sm:$0xff] %vm326_vm0, %v496_v37 }
 0x115   :  { %v504_v60 = vld [vmem:[#allocation4] sm:$0xff] }
 0x116   :  { %v505_v33 = vpack.c.bf16 %v504_v60, %v504_v60 }
 0x118   :  { %1388 = vmatmul.mubr.msk.bf16.vlgmr.msra.gmra.mrb[4].mxu0 %vm326_vm0, %v505_v33  ;;  %1389 = vmatmul.mubr.msk.bf16.vlgmr.msra.gmra.mrb[4].mxu1 %vm326_vm0, %v505_v33 }
 0x119   :  { %633 = vmatpush1.bf16.msra.mxu0 %v1647_v3  ;;  %674 = vmatpush1.bf16.msra.mxu1 %v1652_v4 }
 0x11a   :  { %634 = vmatprep.subr.bf16.mxu0 %v1661_v6  ;;  %675 = vmatprep.subr.bf16.mxu1 %v1669_v7 }
 0x11b   :  { %664 = vmatprep.mubr.bf16.mxu0 %v2094_v61  ;;  %705 = vmatprep.mubr.bf16.mxu1 %v2094_v61 }
 0x11d   :  { %635 = vmatpush1.bf16.msra.mxu0 %v1674_v8  ;;  %676 = vmatpush1.bf16.msra.mxu1 %v1680_v9 }
 0x11e   :  { %755 = vmatprep.subr.bf16.mxu0 %v1634_v0  ;;  %796 = vmatprep.subr.bf16.mxu1 %v1639_v1 }
 0x1eb   :  { %v543_v47 = vpop.f32.mrb[4].mxu0  ;;  %v584_v44 = vpop.f32.mrb[4].mxu1 }
 0x1ec   :  { %v591_v36 = vadd.f32 %v543_v47, %v1833_v5  ;;  %v593_v38 = vadd.f32 %v584_v44, %v268_v34  ;;  %v545_v52 = vpop.f32.mrb[5].mxu0  ;;  %v586_v27 = vpop.f32.mrb[5].mxu1 }
 0x1ed   :  { %v592_v39 = vadd.f32 %v545_v52, %v267_v35  ;;  %v594_v42 = vadd.f32 %v586_v27, %v269_v22  ;;  %v547_v2 = vpop.f32.mrb[6].mxu0  ;;  %v588_v29 = vpop.f32.mrb[6].mxu1 }
 0x1ee   :  { %v1390_v40 = vmul.f32 -1.442695, %v591_v36  ;;  %v548_v51 = vpop.f32.mrb[7].mxu0  ;;  %v589_v13 = vpop.f32.mrb[7].mxu1 }
 0x1ef   :  { %v1391_v58 = vmul.f32 -1.442695, %v592_v39  ;;  %v1392_v37 = vmul.f32 -1.442695, %v594_v42  ;;  %v271_v39 = vadd.f32 %v1893_v59, %v1784_v56  ;;  %v273_v42 = vadd.f32 %v1903_v26, %v1786_v57 }
 0x1f0   :  { %1460 = vpow2.f32 %v1390_v40 }
 0x1f1   :  { %1462 = vpow2.f32 %v1391_v58 }
 0x1f2   :  { %1464 = vpow2.f32 %v1392_v37 }
 0x1f3   :  { %1466 = vtanh.f32 %v593_v38  ;;  %v272_v38 = vadd.f32 %v1912_v28, %v1782_v55 }
 0x1fa   :  { %v1461_v60 = vpop.eup %1460 }
 0x1fb   :  { %v1463_v33 = vpop.eup %1462  ;;  %v598_v25 = vadd.f32 1.0, %v1461_v60 }
 0x1fc   :  { %v604_v5 = vadd.f32 1.0, %v1463_v33  ;;  %v1465_v24 = vpop.eup %1464 }
 0x1fd   :  { %1468 = vrcp.f32 %v598_v25  ;;  %v1467_v63 = vpop.eup %1466  ;;  %v611_v23 = vadd.f32 1.0, %v1465_v24 }
 0x1fe   :  { %1470 = vrcp.f32 %v604_v5 }
 0x1ff   :  { %1472 = vrcp.f32 %v611_v23 }
 0x207   :  { %v1469_v43 = vpop.eup %1468 }
 0x208   :  { %v1471_v32 = vpop.eup %1470  ;;  %v616_v62 = vmul.f32 %v1469_v43, %v1467_v63 }
 0x209   :  { %v615_v11 = vmul.f32 %v1471_v32, %v614_v41  ;;  %v1473_v47 = vpop.eup %1472 }
 0x20b   :  { %v617_v34 = vadd.f32 %v616_v62, %v615_v11 }
 0x20d   :  { %1474 = vtanh.f32 %v617_v34  ;;  %621 = vst.msk [vmem:[#allocation2] sm:$0xff] %vm326_vm0, %v617_v34 }
 0x214   :  { %v737_v11 = vld [vmem:[#allocation2] sm:$0xff] }
 0x217   :  { %v1475_v44 = vpop.eup %1474 }
 0x218   :  { %v619_v35 = vmul.f32 %v1475_v44, %v1473_v47 }
 0x21a   :  { %620 = vst.msk [vmem:[#allocation4] sm:$0xff] %vm326_vm0, %v619_v35 }
 0x221   :  { %v627_v22 = vld [vmem:[#allocation4] sm:$0xff] }
 0x222   :  { %v628_v36 = vpack.c.bf16 %v627_v22, %v627_v22 }
 0x224   :  { %1393 = vmatmul.mubr.msk.bf16.vlgmr.msra.gmra.mrb[8].mxu0 %vm326_vm0, %v628_v36  ;;  %1394 = vmatmul.mubr.msk.bf16.vlgmr.msra.gmra.mrb[8].mxu1 %vm326_vm0, %v628_v36 }
 0x225   :  { %756 = vmatpush1.bf16.msra.mxu0 %v1647_v3  ;;  %797 = vmatpush1.bf16.msra.mxu1 %v1652_v4 }
 0x226   :  { %757 = vmatprep.subr.bf16.mxu0 %v1661_v6  ;;  %798 = vmatprep.subr.bf16.mxu1 %v1669_v7 }
 0x227   :  { %787 = vmatprep.mubr.bf16.mxu0 %v2094_v61  ;;  %828 = vmatprep.mubr.bf16.mxu1 %v2094_v61 }
 0x229   :  { %758 = vmatpush1.bf16.msra.mxu0 %v1674_v8  ;;  %799 = vmatpush1.bf16.msra.mxu1 %v1680_v9 }
 0x22a   :  { %878 = vmatprep.subr.bf16.mxu0 %v1634_v0  ;;  %919 = vmatprep.subr.bf16.mxu1 %v1639_v1 }
 0x2f7   :  { %v666_v52 = vpop.f32.mrb[8].mxu0  ;;  %v707_v27 = vpop.f32.mrb[8].mxu1 }
 0x2f8   :  { %v714_v2 = vadd.f32 %v666_v52, %v1801_v14  ;;  %v716_v29 = vadd.f32 %v707_v27, %v272_v38  ;;  %v668_v40 = vpop.f32.mrb[9].mxu0  ;;  %v709_v51 = vpop.f32.mrb[9].mxu1  ;;  %v276_v27 = vadd.f32 %v1912_v28, %v1803_v17 }
 0x2f9   :  { %v715_v13 = vadd.f32 %v668_v40, %v271_v39  ;;  %v717_v58 = vadd.f32 %v709_v51, %v273_v42  ;;  %v670_v37 = vpop.f32.mrb[10].mxu0  ;;  %v711_v60 = vpop.f32.mrb[10].mxu1 }
 0x2fa   :  { %v1395_v33 = vmul.f32 -1.442695, %v714_v2  ;;  %v671_v25 = vpop.f32.mrb[11].mxu0  ;;  %v712_v55 = vpop.f32.mrb[11].mxu1  ;;  %v275_v2 = vadd.f32 %v1893_v59, %v1805_v18 }
 0x2fb   :  { %v1396_v5 = vmul.f32 -1.442695, %v715_v13  ;;  %v1397_v24 = vmul.f32 -1.442695, %v717_v58 }
 0x2fc   :  { %1476 = vpow2.f32 %v1395_v33 }
 0x2fd   :  { %1478 = vpow2.f32 %v1396_v5 }
 0x2fe   :  { %1480 = vpow2.f32 %v1397_v24 }
 0x2ff   :  { %1482 = vtanh.f32 %v716_v29  ;;  %v277_v29 = vadd.f32 %v1903_v26, %v1807_v19 }
 0x306   :  { %v1477_v56 = vpop.eup %1476 }
 0x307   :  { %v1479_v63 = vpop.eup %1478  ;;  %v721_v43 = vadd.f32 1.0, %v1477_v56 }
 0x308   :  { %v727_v57 = vadd.f32 1.0, %v1479_v63  ;;  %v1481_v14 = vpop.eup %1480 }
 0x309   :  { %1484 = vrcp.f32 %v721_v43  ;;  %v1483_v32 = vpop.eup %1482  ;;  %v734_v34 = vadd.f32 1.0, %v1481_v14 }
 0x30a   :  { %1486 = vrcp.f32 %v727_v57 }
 0x30b   :  { %1488 = vrcp.f32 %v734_v34 }
 0x313   :  { %v1485_v62 = vpop.eup %1484 }
 0x314   :  { %v1487_v41 = vpop.eup %1486  ;;  %v739_v23 = vmul.f32 %v1485_v62, %v1483_v32 }
 0x315   :  { %v738_v47 = vmul.f32 %v1487_v41, %v737_v11  ;;  %v1489_v35 = vpop.eup %1488 }
 0x317   :  { %v740_v44 = vadd.f32 %v739_v23, %v738_v47 }
 0x319   :  { %1490 = vtanh.f32 %v740_v44  ;;  %744 = vst.msk [vmem:[#allocation2] sm:$0xff] %vm326_vm0, %v740_v44 }
 0x320   :  { %v860_v41 = vld [vmem:[#allocation2] sm:$0xff] }
 0x323   :  { %v1491_v22 = vpop.eup %1490 }
 0x324   :  { %v742_v36 = vmul.f32 %v1491_v22, %v1489_v35 }
 0x326   :  { %743 = vst.msk [vmem:[#allocation4] sm:$0xff] %vm326_vm0, %v742_v36 }
 0x32d   :  { %v750_v38 = vld [vmem:[#allocation4] sm:$0xff] }
 0x32e   :  { %v751_v52 = vpack.c.bf16 %v750_v38, %v750_v38  ;;  %v280_v38 = vadd.f32 %v1912_v28, %v1820_v49 }
 0x330   :  { %1398 = vmatmul.mubr.msk.bf16.vlgmr.msra.gmra.mrb[12].mxu0 %vm326_vm0, %v751_v52  ;;  %1399 = vmatmul.mubr.msk.bf16.vlgmr.msra.gmra.mrb[12].mxu1 %vm326_vm0, %v751_v52 }
 0x331   :  { %879 = vmatpush1.bf16.msra.mxu0 %v1647_v3  ;;  %920 = vmatpush1.bf16.msra.mxu1 %v1652_v4 }
 0x332   :  { %880 = vmatprep.subr.bf16.mxu0 %v1661_v6  ;;  %921 = vmatprep.subr.bf16.mxu1 %v1669_v7 }
 0x333   :  { %910 = vmatprep.mubr.bf16.mxu0 %v2094_v61  ;;  %951 = vmatprep.mubr.bf16.mxu1 %v2094_v61 }
 0x335   :  { %881 = vmatpush1.bf16.msra.mxu0 %v1674_v8  ;;  %922 = vmatpush1.bf16.msra.mxu1 %v1680_v9 }
 0x336   :  { %1001 = vmatprep.subr.bf16.mxu0 %v1634_v0  ;;  %1042 = vmatprep.subr.bf16.mxu1 %v1639_v1 }
 0x403   :  { %v789_v39 = vpop.f32.mrb[12].mxu0  ;;  %v830_v42 = vpop.f32.mrb[12].mxu1 }
 0x404   :  { %v837_v40 = vadd.f32 %v789_v39, %v1817_v45  ;;  %v839_v51 = vadd.f32 %v830_v42, %v276_v27  ;;  %v791_v13 = vpop.f32.mrb[13].mxu0  ;;  %v832_v58 = vpop.f32.mrb[13].mxu1  ;;  %v279_v39 = vadd.f32 %v1893_v59, %v1822_v50  ;;  %v281_v42 = vadd.f32 %v1903_v26, %v1838_v12 }
 0x405   :  { %v838_v37 = vadd.f32 %v791_v13, %v275_v2  ;;  %v840_v60 = vadd.f32 %v832_v58, %v277_v29  ;;  %v793_v33 = vpop.f32.mrb[14].mxu0  ;;  %v834_v25 = vpop.f32.mrb[14].mxu1 }
 0x406   :  { %v1400_v55 = vmul.f32 -1.442695, %v837_v40  ;;  %v794_v5 = vpop.f32.mrb[15].mxu0  ;;  %v835_v17 = vpop.f32.mrb[15].mxu1 }
 0x407   :  { %v1401_v24 = vmul.f32 -1.442695, %v838_v37  ;;  %v1402_v56 = vmul.f32 -1.442695, %v840_v60 }
 0x408   :  { %1492 = vpow2.f32 %v1400_v55 }
 0x409   :  { %1494 = vpow2.f32 %v1401_v24 }
 0x40a   :  { %1496 = vpow2.f32 %v1402_v56 }
 0x40b   :  { %1498 = vtanh.f32 %v839_v51 }
 0x412   :  { %v1493_v18 = vpop.eup %1492 }
 0x413   :  { %v1495_v63 = vpop.eup %1494  ;;  %v844_v43 = vadd.f32 1.0, %v1493_v18 }
 0x414   :  { %v850_v19 = vadd.f32 1.0, %v1495_v63  ;;  %v1497_v45 = vpop.eup %1496 }
 0x415   :  { %1500 = vrcp.f32 %v844_v43  ;;  %v1499_v57 = vpop.eup %1498  ;;  %v857_v23 = vadd.f32 1.0, %v1497_v45 }
 0x416   :  { %1502 = vrcp.f32 %v850_v19 }
 0x417   :  { %1504 = vrcp.f32 %v857_v23 }
 0x41f   :  { %v1501_v14 = vpop.eup %1500 }
 0x420   :  { %v1503_v32 = vpop.eup %1502  ;;  %v862_v62 = vmul.f32 %v1501_v14, %v1499_v57 }
 0x421   :  { %v861_v11 = vmul.f32 %v1503_v32, %v860_v41  ;;  %v1505_v47 = vpop.eup %1504 }
 0x423   :  { %v863_v34 = vadd.f32 %v862_v62, %v861_v11 }
 0x425   :  { %1506 = vtanh.f32 %v863_v34  ;;  %867 = vst.msk [vmem:[#allocation2] sm:$0xff] %vm326_vm0, %v863_v34 }
 0x42c   :  { %v983_v19 = vld [vmem:[#allocation2] sm:$0xff] }
 0x42f   :  { %v1507_v44 = vpop.eup %1506 }
 0x430   :  { %v865_v35 = vmul.f32 %v1507_v44, %v1505_v47 }
 0x432   :  { %866 = vst.msk [vmem:[#allocation4] sm:$0xff] %vm326_vm0, %v865_v35 }
 0x439   :  { %v873_v22 = vld [vmem:[#allocation4] sm:$0xff] }
 0x43a   :  { %v874_v36 = vpack.c.bf16 %v873_v22, %v873_v22 }
 0x43c   :  { %1403 = vmatmul.mubr.msk.bf16.vlgmr.msra.gmra.mrb[16].mxu0 %vm326_vm0, %v874_v36  ;;  %1404 = vmatmul.mubr.msk.bf16.vlgmr.msra.gmra.mrb[16].mxu1 %vm326_vm0, %v874_v36 }
 0x43d   :  { %1002 = vmatpush1.bf16.msra.mxu0 %v1647_v3  ;;  %1043 = vmatpush1.bf16.msra.mxu1 %v1652_v4 }
 0x43e   :  { %1003 = vmatprep.subr.bf16.mxu0 %v1661_v6  ;;  %1044 = vmatprep.subr.bf16.mxu1 %v1669_v7 }
 0x43f   :  { %1033 = vmatprep.mubr.bf16.mxu0 %v2094_v61  ;;  %1074 = vmatprep.mubr.bf16.mxu1 %v2094_v61 }
 0x441   :  { %1004 = vmatpush1.bf16.msra.mxu0 %v1674_v8  ;;  %1045 = vmatpush1.bf16.msra.mxu1 %v1680_v9 }
 0x442   :  { %1124 = vmatprep.subr.bf16.mxu0 %v1634_v0  ;;  %1165 = vmatprep.subr.bf16.mxu1 %v1639_v1 }
 0x50f   :  { %v912_v52 = vpop.f32.mrb[16].mxu0  ;;  %v953_v27 = vpop.f32.mrb[16].mxu1 }
 0x510   :  { %v960_v2 = vadd.f32 %v912_v52, %v1836_v10  ;;  %v962_v29 = vadd.f32 %v953_v27, %v280_v38  ;;  %v914_v40 = vpop.f32.mrb[17].mxu0  ;;  %v955_v51 = vpop.f32.mrb[17].mxu1 }
 0x511   :  { %v961_v13 = vadd.f32 %v914_v40, %v279_v39  ;;  %v963_v58 = vadd.f32 %v955_v51, %v281_v42  ;;  %v916_v37 = vpop.f32.mrb[18].mxu0  ;;  %v957_v60 = vpop.f32.mrb[18].mxu1 }
 0x512   :  { %v1405_v33 = vmul.f32 -1.442695, %v960_v2  ;;  %v917_v25 = vpop.f32.mrb[19].mxu0  ;;  %v958_v49 = vpop.f32.mrb[19].mxu1 }
 0x513   :  { %v1406_v55 = vmul.f32 -1.442695, %v961_v13  ;;  %v1407_v5 = vmul.f32 -1.442695, %v963_v58 }
 0x514   :  { %1508 = vpow2.f32 %v1405_v33 }
 0x515   :  { %1510 = vpow2.f32 %v1406_v55 }
 0x516   :  { %1512 = vpow2.f32 %v1407_v5 }
 0x517   :  { %1514 = vtanh.f32 %v962_v29 }
 0x51e   :  { %v1509_v50 = vpop.eup %1508 }
 0x51f   :  { %v1511_v17 = vpop.eup %1510  ;;  %v967_v24 = vadd.f32 1.0, %v1509_v50  ;;  %v1572_v50 = vld [vmem:[%s2088_s3] ss:$16 sps:$4 sm:$0xff]  }
 0x520   :  { %v973_v10 = vadd.f32 1.0, %v1511_v17  ;;  %v1513_v12 = vpop.eup %1512  ;;  %v1573_v17 = vld [vmem:[%s2088_s3 + $0x8] ss:$16 sps:$4 sm:$0xff]  }
 0x521   :  { %1516 = vrcp.f32 %v967_v24  ;;  %v1515_v56 = vpop.eup %1514  ;;  %v980_v45 = vadd.f32 1.0, %v1513_v12  ;;  %v1574_v24 = vld [vmem:[%s2088_s3 + $0x24] ss:$16 sps:$4 sm:$0xff]   ;;  %v1576_v12 = vld [vmem:[%s2088_s3 + $0x20] ss:$16 sps:$4 sm:$0xff]  }
 0x522   :  { %1518 = vrcp.f32 %v973_v10  ;;  %v1575_v10 = vld [vmem:[%s2088_s3 + $0x2c] ss:$16 sps:$4 sm:$0xff]  }
 0x523   :  { %1520 = vrcp.f32 %v980_v45 }
 0x52b   :  { %v1517_v18 = vpop.eup %1516 }
 0x52c   :  { %v1519_v63 = vpop.eup %1518  ;;  %v985_v43 = vmul.f32 %v1517_v18, %v1515_v56  ;;  %v1577_v56 = vld [vmem:[%s2088_s3 + $0x28] ss:$16 sps:$4 sm:$0xff]   ;;  %v288_v18 = vadd.f32 %v1912_v28, %v1857_v53  ;;  %s1605_s3 = smov [#allocation4]  }
 0x52d   :  { %v984_v57 = vmul.f32 %v1519_v63, %v983_v19  ;;  %v1521_v32 = vpop.eup %1520  ;;  %v287_v19 = vadd.f32 %v1893_v59, %v1859_v54  ;;  %s1366_s10 = sshll.u32 %s1605_s3, 4  ;;  %s1367_s10 = int_to_ptr.vmem [resolvable:$true] %s1366_s10 }
 0x52e   :  { %s1578_s11 = scalar_lea.vmem %s1367_s10, 128  ;;  %p1583_p1 = scmp.lt.s32.totalorder %s1367_s10, %s1367_s10 }
 0x52f   :  { %v986_v14 = vadd.f32 %v985_v43, %v984_v57  ;;  %p1579_p0 = scmp.ne.s32.totalorder %s1367_s10, %s1578_s11  ;;  %p1584_p2 = scmp.lt.s32.totalorder %s1578_s11, %s1578_s11 }
 0x531   :  { %1522 = vtanh.f32 %v986_v14  ;;  %990 = vst.msk [vmem:[#allocation2] sm:$0xff] %vm326_vm0, %v986_v14  ;;  %p1585_p3 = por %p1584_p2, %p1583_p1 }
 0x533   :  { %p1586_p4 = pnand %p1585_p3, %p1579_p0 }
 0x538   :  { %v1106_v13 = vld [vmem:[#allocation2] sm:$0xff] }
 0x53b   :  { %v1523_v62 = vpop.eup %1522 }
 0x53c   :  { %v988_v41 = vmul.f32 %v1523_v62, %v1521_v32 }
 0x53e   :  { %989 = vst.msk [vmem:[#allocation4] sm:$0xff] %vm326_vm0, %v988_v41 }
 0x545   :  { %v996_v23 = vld [vmem:[#allocation4] sm:$0xff] }
 0x546   :  { %v997_v11 = vpack.c.bf16 %v996_v23, %v996_v23 }
 0x548   :  { %1408 = vmatmul.mubr.msk.bf16.vlgmr.msra.gmra.mrb[20].mxu0 %vm326_vm0, %v997_v11  ;;  %1409 = vmatmul.mubr.msk.bf16.vlgmr.msra.gmra.mrb[20].mxu1 %vm326_vm0, %v997_v11 }
 0x549   :  { %1125 = vmatpush1.bf16.msra.mxu0 %v1647_v3  ;;  %1166 = vmatpush1.bf16.msra.mxu1 %v1652_v4  ;;  %v284_v3 = vadd.f32 %v1912_v28, %v1840_v15 }
 0x54a   :  { %1126 = vmatprep.subr.bf16.mxu0 %v1661_v6  ;;  %1167 = vmatprep.subr.bf16.mxu1 %v1669_v7  ;;  %v283_v6 = vadd.f32 %v1893_v59, %v1842_v16  ;;  %v285_v7 = vadd.f32 %v1903_v26, %v1855_v48 }
 0x54b   :  { %1156 = vmatprep.mubr.bf16.mxu0 %v2094_v61  ;;  %1197 = vmatprep.mubr.bf16.mxu1 %v2094_v61 }
 0x54d   :  { %1127 = vmatpush1.bf16.msra.mxu0 %v1674_v8  ;;  %1168 = vmatpush1.bf16.msra.mxu1 %v1680_v9 }
 0x54e   :  { %1247 = vmatprep.subr.bf16.mxu0 %v1634_v0  ;;  %1288 = vmatprep.subr.bf16.mxu1 %v1639_v1 }
 0x61b   :  { %v1035_v4 = vpop.f32.mrb[20].mxu0  ;;  %v1076_v34 = vpop.f32.mrb[20].mxu1 }
 0x61c   :  { %v1083_v47 = vadd.f32 %v1035_v4, %v1853_v46  ;;  %v1085_v8 = vadd.f32 %v1076_v34, %v284_v3  ;;  %v1037_v44 = vpop.f32.mrb[21].mxu0  ;;  %v1078_v9 = vpop.f32.mrb[21].mxu1 }
 0x61d   :  { %v1084_v35 = vadd.f32 %v1037_v44, %v283_v6  ;;  %v1086_v0 = vadd.f32 %v1078_v9, %v285_v7  ;;  %v1039_v22 = vpop.f32.mrb[22].mxu0  ;;  %v1080_v1 = vpop.f32.mrb[22].mxu1 }
 0x61e   :  { %v1410_v36 = vmul.f32 -1.442695, %v1083_v47  ;;  %v1040_v38 = vpop.f32.mrb[23].mxu0  ;;  %v1081_v15 = vpop.f32.mrb[23].mxu1 }
 0x61f   :  { %v1411_v52 = vmul.f32 -1.442695, %v1084_v35  ;;  %v1412_v27 = vmul.f32 -1.442695, %v1086_v0 }
 0x620   :  { %1524 = vpow2.f32 %v1410_v36 }
 0x621   :  { %1526 = vpow2.f32 %v1411_v52 }
 0x622   :  { %1528 = vpow2.f32 %v1412_v27 }
 0x623   :  { %1530 = vtanh.f32 %v1085_v8 }
 0x62a   :  { %v1525_v16 = vpop.eup %1524 }
 0x62b   :  { %v1527_v39 = vpop.eup %1526  ;;  %v1090_v42 = vadd.f32 1.0, %v1525_v16 }
 0x62c   :  { %v1096_v46 = vadd.f32 1.0, %v1527_v39  ;;  %v1529_v48 = vpop.eup %1528  ;;  %v292_v39 = vadd.f32 %v1912_v28, %v1874_v30 }
 0x62d   :  { %1532 = vrcp.f32 %v1090_v42  ;;  %v1531_v2 = vpop.eup %1530  ;;  %v1103_v58 = vadd.f32 1.0, %v1529_v48  ;;  %v291_v48 = vadd.f32 %v1893_v59, %v1876_v31 }
 0x62e   :  { %1534 = vrcp.f32 %v1096_v46 }
 0x62f   :  { %1536 = vrcp.f32 %v1103_v58 }
 0x637   :  { %v1533_v29 = vpop.eup %1532 }
 0x638   :  { %v1535_v40 = vpop.eup %1534  ;;  %v1108_v51 = vmul.f32 %v1533_v29, %v1531_v2  ;;  %v2095_v2 = vld [vmem:[#allocation7_spill] sm:$0xff] }
 0x639   :  { %v1107_v37 = vmul.f32 %v1535_v40, %v1106_v13  ;;  %v1537_v33 = vpop.eup %1536  ;;  %v293_v29 = vadd.f32 %v1903_v26, %v2095_v2  ;;  %v2096_v40 = vld [vmem:[#allocation8_spill] sm:$0xff] }
 0x63b   :  { %v1109_v60 = vadd.f32 %v1108_v51, %v1107_v37 }
 0x63d   :  { %1538 = vtanh.f32 %v1109_v60  ;;  %1113 = vst.msk [vmem:[#allocation2] sm:$0xff] %vm326_vm0, %v1109_v60 }
 0x644   :  { %v1229_v0 = vld [vmem:[#allocation2] sm:$0xff] }
 0x647   :  { %v1539_v25 = vpop.eup %1538 }
 0x648   :  { %v1111_v49 = vmul.f32 %v1539_v25, %v1537_v33 }
 0x64a   :  { %1112 = vst.msk [vmem:[#allocation4] sm:$0xff] %vm326_vm0, %v1111_v49 }
 0x651   :  { %v1119_v55 = vld [vmem:[#allocation4] sm:$0xff] }
 0x652   :  { %v1120_v5 = vpack.c.bf16 %v1119_v55, %v1119_v55 }
 0x654   :  { %1413 = vmatmul.mubr.msk.bf16.vlgmr.msra.gmra.mrb[24].mxu0 %vm326_vm0, %v1120_v5  ;;  %1414 = vmatmul.mubr.msk.bf16.vlgmr.msra.gmra.mrb[24].mxu1 %vm326_vm0, %v1120_v5 }
 0x655   :  { %1248 = vmatpush1.bf16.msra.mxu0 %v1572_v50  ;;  %1289 = vmatpush1.bf16.msra.mxu1 %v1573_v17 }
 0x656   :  { %1249 = vmatprep.subr.bf16.mxu0 %v1574_v24  ;;  %1290 = vmatprep.subr.bf16.mxu1 %v1575_v10 }
 0x657   :  { %1279 = vmatprep.mubr.bf16.mxu0 %v2094_v61  ;;  %1320 = vmatprep.mubr.bf16.mxu1 %v2094_v61  ;;  %v289_v61 = vadd.f32 %v1903_v26, %v1872_v21 }
 0x659   :  { %1250 = vmatpush1.bf16.msra.mxu0 %v1576_v12  ;;  %1291 = vmatpush1.bf16.msra.mxu1 %v1577_v56 }
 0x727   :  { %v1158_v63 = vpop.f32.mrb[24].mxu0  ;;  %v1199_v43 = vpop.f32.mrb[24].mxu1 }
 0x728   :  { %v1206_v45 = vadd.f32 %v1158_v63, %v1870_v20  ;;  %v1208_v57 = vadd.f32 %v1199_v43, %v288_v18  ;;  %v1160_v14 = vpop.f32.mrb[25].mxu0  ;;  %v1201_v32 = vpop.f32.mrb[25].mxu1 }
 0x729   :  { %v1207_v62 = vadd.f32 %v1160_v14, %v287_v19  ;;  %v1209_v41 = vadd.f32 %v1201_v32, %v289_v61  ;;  %v1162_v23 = vpop.f32.mrb[26].mxu0  ;;  %v1203_v11 = vpop.f32.mrb[26].mxu1 }
 0x72a   :  { %v1415_v3 = vmul.f32 -1.442695, %v1206_v45  ;;  %v1163_v4 = vpop.f32.mrb[27].mxu0  ;;  %v1204_v53 = vpop.f32.mrb[27].mxu1 }
 0x72b   :  { %v1416_v34 = vmul.f32 -1.442695, %v1207_v62  ;;  %v1417_v6 = vmul.f32 -1.442695, %v1209_v41 }
 0x72c   :  { %1540 = vpow2.f32 %v1415_v3 }
 0x72d   :  { %1542 = vpow2.f32 %v1416_v34 }
 0x72e   :  { %1544 = vpow2.f32 %v1417_v6 }
 0x72f   :  { %1546 = vtanh.f32 %v1208_v57 }
 0x736   :  { %v1541_v54 = vpop.eup %1540 }
 0x737   :  { %v1543_v7 = vpop.eup %1542  ;;  %v1213_v47 = vadd.f32 1.0, %v1541_v54 }
 0x738   :  { %v1219_v20 = vadd.f32 1.0, %v1543_v7  ;;  %v1545_v21 = vpop.eup %1544 }
 0x739   :  { %1548 = vrcp.f32 %v1213_v47  ;;  %v1547_v8 = vpop.eup %1546  ;;  %v1226_v22 = vadd.f32 1.0, %v1545_v21 }
 0x73a   :  { %1550 = vrcp.f32 %v1219_v20 }
 0x73b   :  { %1552 = vrcp.f32 %v1226_v22 }
 0x743   :  { %v1549_v44 = vpop.eup %1548 }
 0x744   :  { %v1551_v9 = vpop.eup %1550  ;;  %v1231_v35 = vmul.f32 %v1549_v44, %v1547_v8 }
 0x745   :  { %v1230_v1 = vmul.f32 %v1551_v9, %v1229_v0  ;;  %v1553_v38 = vpop.eup %1552 }
 0x747   :  { %v1232_v36 = vadd.f32 %v1231_v35, %v1230_v1 }
 0x749   :  { %1554 = vtanh.f32 %v1232_v36  ;;  %1236 = vst.msk [vmem:[#allocation2] sm:$0xff] %vm326_vm0, %v1232_v36 }
 0x750   :  { %v1352_v63 = vld [vmem:[#allocation2] sm:$0xff] }
 0x753   :  { %v1555_v15 = vpop.eup %1554 }
 0x754   :  { %v1234_v52 = vmul.f32 %v1555_v15, %v1553_v38 }
 0x756   :  { %1235 = vst.msk [vmem:[#allocation4] sm:$0xff] %vm326_vm0, %v1234_v52 }
 0x75d   :  { %v1242_v27 = vld [vmem:[#allocation4] sm:$0xff] }
 0x75e   :  { %v1243_v16 = vpack.c.bf16 %v1242_v27, %v1242_v27 }
 0x760   :  { %1418 = vmatmul.mubr.msk.bf16.vlgmr.msra.gmra.mrb[28].mxu0 %vm326_vm0, %v1243_v16  ;;  %1419 = vmatmul.mubr.msk.bf16.vlgmr.msra.gmra.mrb[28].mxu1 %vm326_vm0, %v1243_v16 }
 0x833   :  { %v1281_v42 = vpop.f32.mrb[28].mxu0  ;;  %v1322_v46 = vpop.f32.mrb[28].mxu1 }
 0x834   :  { %v1329_v51 = vadd.f32 %v1281_v42, %v2096_v40  ;;  %v1331_v13 = vadd.f32 %v1322_v46, %v292_v39  ;;  %v1283_v58 = vpop.f32.mrb[29].mxu0  ;;  %v1324_v37 = vpop.f32.mrb[29].mxu1 }
 0x835   :  { %v1330_v60 = vadd.f32 %v1283_v58, %v291_v48  ;;  %v1332_v33 = vadd.f32 %v1324_v37, %v293_v29  ;;  %v1285_v25 = vpop.f32.mrb[30].mxu0  ;;  %v1326_v49 = vpop.f32.mrb[30].mxu1 }
 0x836   :  { %v1420_v55 = vmul.f32 -1.442695, %v1329_v51  ;;  %v1286_v5 = vpop.f32.mrb[31].mxu0  ;;  %v1327_v30 = vpop.f32.mrb[31].mxu1 }
 0x837   :  { %v1421_v28 = vmul.f32 -1.442695, %v1330_v60  ;;  %v1422_v50 = vmul.f32 -1.442695, %v1332_v33 }
 0x838   :  { %1556 = vpow2.f32 %v1420_v55 }
 0x839   :  { %1558 = vpow2.f32 %v1421_v28 }
 0x83a   :  { %1560 = vpow2.f32 %v1422_v50 }
 0x83b   :  { %1562 = vtanh.f32 %v1331_v13 }
 0x842   :  { %v1557_v31 = vpop.eup %1556 }
 0x843   :  { %v1559_v59 = vpop.eup %1558  ;;  %v1336_v17 = vadd.f32 1.0, %v1557_v31 }
 0x844   :  { %v1342_v26 = vadd.f32 1.0, %v1559_v59  ;;  %v1561_v24 = vpop.eup %1560 }
 0x845   :  { %1564 = vrcp.f32 %v1336_v17  ;;  %v1563_v10 = vpop.eup %1562  ;;  %v1349_v43 = vadd.f32 1.0, %v1561_v24 }
 0x846   :  { %1566 = vrcp.f32 %v1342_v26 }
 0x847   :  { %1568 = vrcp.f32 %v1349_v43 }
 0x84f   :  { %v1565_v12 = vpop.eup %1564 }
 0x850   :  { %v1567_v56 = vpop.eup %1566  ;;  %v1354_v18 = vmul.f32 %v1565_v12, %v1563_v10 }
 0x851   :  { %v1353_v19 = vmul.f32 %v1567_v56, %v1352_v63  ;;  %v1569_v45 = vpop.eup %1568 }
 0x853   :  { %v1355_v61 = vadd.f32 %v1354_v18, %v1353_v19 }
 0x855   :  { %1570 = vtanh.f32 %v1355_v61  ;;  %1359 = vst.msk [vmem:[#allocation2] sm:$0xff] %vm326_vm0, %v1355_v61 }
 0x85f   :  { %v1571_v57 = vpop.eup %1570 }
 0x860   :  { %v1357_v14 = vmul.f32 %v1571_v57, %v1569_v45 }
 0x862   :  { %1358 = vst.msk [vmem:[#allocation4] sm:$0xff] %vm326_vm0, %v1357_v14 }
 0x863   :  { %1589 = shalt.err (!%p1586_p4)
}
 0x864   :  { %s1590_s14 = scalar_lea.hbm %s2089_s4, 128 }
 0x865   :  { %p1591_p5 = scmp.ne.s32.totalorder %s2089_s4, %s1590_s14  ;;  %p1594_p6 = scmp.lt.u32.totalorder %s1590_s14, %s2089_s4 }
 0x867   :  { %p1596_p7 = pnand %p1594_p6, %p1591_p5 }
 0x869   :  { %1599 = shalt.err (!%p1596_p7)
}
 0x86a   :  { %1369 = dma.vmem_to_hbm [thread:$0]  %s1367_s10, 128, %s2089_s4, [#allocation5]  }
 0x86b   :  { %1600 = dma.done.wait [#allocation5], 128  }
 0x86c   :  { %1601 = vsyncadd [#allocation5], 4294967168 }
 0x86d   :  { %1373 = vsyncpa [#allocation5], 1 }

</bundles_post_ra>
